<compile_context>
chip_gen: v7x
topology: tpu7x:2x2x1
jax: 0.10.0
libtpu: 0.0.40
codegen_flags: <defaults>
</compile_context>

<pallas_src>
import functools

import jax
import jax.numpy as jnp
from jax.experimental import pallas as pl
from jax.experimental.pallas import tpu as pltpu


# ----------------------------------------------------------------------------
# Pallas kernels (one grid step == one image)
# ----------------------------------------------------------------------------
def _conv_block_kernel(x_ref, w_ref, b_ref, o_ref, *, ho, wo, neg_slope):
    """Fused Conv(k=4,s=2,p=1) + bias + LeakyReLU for one image.

    x_ref:(1, 2k*Cin, (Ho+1)*Wo) bf16 tap components (rows ordered (p,kj,c)).
    w_ref:(2, Cout, 2k*Cin) bf16 weight halves for row shift a in {0,1}.
    b_ref:(Cout,1) f32.  o_ref:(1, Cout, Ho*Wo) bf16.
    """
    hw = ho * wo
    x = x_ref[0]                                    # (2k*Cin, (Ho+1)*Wo)
    acc = jnp.dot(w_ref[0], x[:, 0:hw], preferred_element_type=jnp.float32)
    acc = acc + jnp.dot(w_ref[1], x[:, wo:wo + hw],
                        preferred_element_type=jnp.float32)
    acc = acc + b_ref[...]
    if neg_slope is not None:
        acc = jnp.where(acc >= 0.0, acc, neg_slope * acc)
    o_ref[0] = acc.astype(o_ref.dtype)


def _conv1x1_kernel(x_ref, w_ref, b_ref, o_ref):
    """Final 1x1 conv (logits): o = w @ x + b for one image."""
    acc = jnp.dot(w_ref[...], x_ref[0], preferred_element_type=jnp.float32)
    o_ref[0] = (acc + b_ref[...]).astype(o_ref.dtype)


def _avgpool_kernel(x_ref, inv_ref, o_ref, *, ho, wo):
    """AvgPool2d(3,2,1,count_include_pad=False) for one image.

    x_ref:(1, 6, C, (Ho+1)*Wo) bf16 tap components; inv_ref:(1, Ho*Wo) f32
    reciprocal valid-tap counts; o_ref:(1, C, Ho*Wo) bf16.
    """
    hw = ho * wo
    x = x_ref[0]                                    # (6, C, (Ho+1)*Wo)
    s = x[0, :, 0:hw].astype(jnp.float32)
    for ci in range(1, 6):                          # row shift a=0: all 6 comps
        s = s + x[ci, :, 0:hw].astype(jnp.float32)
    for ci in range(3):                             # row shift a=1: p=0 comps (ki=2)
        s = s + x[ci, :, wo:wo + hw].astype(jnp.float32)
    o_ref[0] = (s * inv_ref[...]).astype(o_ref.dtype)


# ----------------------------------------------------------------------------
# Plain-JAX glue: polyphase tap components (cheap strided gather, ~1x bytes)
# ----------------------------------------------------------------------------
def _tap_components(x, *, k, pad, out_h, out_w):
    """x:(N,C,H,W) -> (N, 2*k, C, (out_h+1)*out_w) bf16.

    Component (p, kj) = zero-padded x at rows p::2, cols (kj)::2.  A stride-2
    tap (ki, kj) is rows [a, a+out_h) of component (ki % 2, kj), a = ki // 2,
    i.e. a contiguous lane slice of the flattened component block.
    """
    n, c, _, _ = x.shape
    xb = x.astype(jnp.bfloat16)
    # Generous bottom/right pad so strided slices never clip (extras unused).
    xp = jnp.pad(xb, ((0, 0), (0, 0), (pad, pad + 2), (pad, pad + 1)))
    comps = []
    for p in range(2):
        rows = xp[:, :, p:p + 2 * (out_h + 1):2, :]              # (N,C,out_h+1,Wp)
        for kj in range(k):
            comps.append(rows[:, :, :, kj:kj + 2 * out_w:2])     # (N,C,out_h+1,out_w)
    comps = jnp.stack(comps, axis=1)                             # (N,2k,C,out_h+1,out_w)
    # TODO(synk): this strided gather (one fused XLA copy) could be folded into
    # the kernel with manual DMA from a pl.ANY input for truly zero extra passes.
    return comps.reshape(n, 2 * k, c, (out_h + 1) * out_w)


# ----------------------------------------------------------------------------
# Layer wrappers
# ----------------------------------------------------------------------------
def conv_block(x, w, b, *, neg_slope=0.2):
    """ConvBlock: zero-pad Conv2d(4,2,1) + bias + LeakyReLU.  NCHW in, bf16 NCHW out."""
    n, cin, h, wdt = x.shape
    cout, cin2, kh, kw = w.shape
    assert cin == cin2 and kh == 4 and kw == 4
    k, stride, pad = 4, 2, 1
    ho = (h + 2 * pad - k) // stride + 1
    wo = (wdt + 2 * pad - k) // stride + 1

    comps = _tap_components(x, k=k, pad=pad, out_h=ho, out_w=wo)
    comps = comps.reshape(n, 2 * k * cin, (ho + 1) * wo)
    # Weight halves for row shifts a in {0,1}; columns ordered (p, kj, c) to
    # match the component-row ordering of `comps`.
    w_a = jnp.stack(
        [w[:, :, 2 * a:2 * a + 2, :].transpose(0, 2, 3, 1).reshape(cout, 2 * k * cin)
         for a in range(2)],
        axis=0).astype(jnp.bfloat16)                                # (2,Cout,2k*Cin)
    b2 = b.reshape(cout, 1).astype(jnp.float32)

    kernel = functools.partial(_conv_block_kernel, ho=ho, wo=wo, neg_slope=neg_slope)
    out = pl.pallas_call(
        kernel,
        out_shape=jax.ShapeDtypeStruct((n, cout, ho * wo), jnp.bfloat16),
        grid=(n,),
        in_specs=[
            pl.BlockSpec((1, 2 * k * cin, (ho + 1) * wo), lambda i: (i, 0, 0)),
            pl.BlockSpec((2, cout, 2 * k * cin), lambda i: (0, 0, 0)),
            pl.BlockSpec((cout, 1), lambda i: (0, 0)),
        ],
        out_specs=pl.BlockSpec((1, cout, ho * wo), lambda i: (i, 0, 0)),
        compiler_params=pltpu.CompilerParams(dimension_semantics=("parallel",)),
        cost_estimate=pl.CostEstimate(
            flops=2 * n * cout * (k * k * cin) * ho * wo,
            transcendentals=0,
            bytes_accessed=2 * comps.size + 2 * w_a.size + 2 * n * cout * ho * wo),
    )(comps, w_a, b2)
    # TODO(synk): for very large images add a spatial row-tile grid axis; whole
    # per-image blocks are fine at discriminator-scale feature maps.
    return out.reshape(n, cout, ho, wo)


def conv1x1(x, w, b):
    """Conv2d(1x1, stride 1) + bias (final logits), f32 out."""
    n, c, h, wdt = x.shape
    cout = w.shape[0]
    x2 = x.reshape(n, c, h * wdt).astype(jnp.bfloat16)
    w2 = w.reshape(cout, c).astype(jnp.bfloat16)
    b2 = b.reshape(cout, 1).astype(jnp.float32)
    out = pl.pallas_call(
        _conv1x1_kernel,
        out_shape=jax.ShapeDtypeStruct((n, cout, h * wdt), jnp.float32),
        grid=(n,),
        in_specs=[
            pl.BlockSpec((1, c, h * wdt), lambda i: (i, 0, 0)),
            pl.BlockSpec((cout, c), lambda i: (0, 0)),
            pl.BlockSpec((cout, 1), lambda i: (0, 0)),
        ],
        out_specs=pl.BlockSpec((1, cout, h * wdt), lambda i: (i, 0, 0)),
        compiler_params=pltpu.CompilerParams(dimension_semantics=("parallel",)),
    )(x2, w2, b2)
    return out.reshape(n, cout, h, wdt)


def avgpool2d_3s2p1(x):
    """AvgPool2d(3, stride=2, padding=1, count_include_pad=False), bf16 out."""
    n, c, h, w = x.shape
    k, stride, pad = 3, 2, 1
    ho = (h + 2 * pad - k) // stride + 1
    wo = (w + 2 * pad - k) // stride + 1

    comps = _tap_components(x, k=k, pad=pad, out_h=ho, out_w=wo)   # (N,6,C,(Ho+1)*Wo)
    ones = jnp.pad(jnp.ones((h, w), jnp.float32), ((pad, pad + 2), (pad, pad + 1)))
    cnt = jnp.zeros((ho, wo), jnp.float32)
    for ki in range(k):
        for kj in range(k):
            cnt = cnt + ones[ki:ki + 2 * ho - 1:2, kj:kj + 2 * wo - 1:2]
    inv = (1.0 / cnt).reshape(1, ho * wo)

    kernel = functools.partial(_avgpool_kernel, ho=ho, wo=wo)
    out = pl.pallas_call(
        kernel,
        out_shape=jax.ShapeDtypeStruct((n, c, ho * wo), jnp.bfloat16),
        grid=(n,),
        in_specs=[
            pl.BlockSpec((1, 2 * k, c, (ho + 1) * wo), lambda i: (i, 0, 0, 0)),
            pl.BlockSpec((1, ho * wo), lambda i: (0, 0)),
        ],
        out_specs=pl.BlockSpec((1, c, ho * wo), lambda i: (i, 0, 0)),
        compiler_params=pltpu.CompilerParams(dimension_semantics=("parallel",)),
    )(comps, inv)
    return out.reshape(n, c, ho, wo)


# ----------------------------------------------------------------------------
# MultiScaleDiscriminator
# ----------------------------------------------------------------------------
def init_params(key, input_dim, n_layers, dim, num_scales):
    """Deterministic synthetic weights (same shapes as the PyTorch module)."""
    params = []
    for _ in range(num_scales):
        layers = []
        cin, cout = input_dim, dim
        for _ in range(n_layers):
            key, kw, kb = jax.random.split(key, 3)
            layers.append({
                "w": 0.05 * jax.random.normal(kw, (cout, cin, 4, 4), jnp.float32),
                "b": 0.05 * jax.random.normal(kb, (cout,), jnp.float32),
            })
            cin, cout = cout, cout * 2
        key, kw, kb = jax.random.split(key, 3)
        layers.append({
            "w": 0.05 * jax.random.normal(kw, (1, cin, 1, 1), jnp.float32),
            "b": 0.05 * jax.random.normal(kb, (1,), jnp.float32),
        })
        params.append(layers)
    return params


def discriminator_forward(x, layers, neg_slope=0.2):
    h = x
    for layer in layers[:-1]:
        h = conv_block(h, layer["w"], layer["b"], neg_slope=neg_slope)
    return conv1x1(h, layers[-1]["w"], layers[-1]["b"])       # (N,1,Ho,Wo) f32


def multiscale_forward(x_nchw, params, num_scales):
    x = x_nchw
    outputs = []
    for s in range(num_scales):
        outputs.append(discriminator_forward(x, params[s]))
        if num_scales > 1 and s < num_scales - 1:             # last pool is unused
            x = avgpool2d_3s2p1(x)
    return outputs


# ----------------------------------------------------------------------------
# Pure-JAX f32 reference (correctness check only)
# ----------------------------------------------------------------------------
def _ref_conv(x, w, b, stride, pad):
    out = jax.lax.conv_general_dilated(
        x, w, window_strides=(stride, stride), padding=((pad, pad), (pad, pad)),
        dimension_numbers=("NCHW", "OIHW", "NCHW"))
    return out + b.reshape(1, -1, 1, 1)


def _ref_avgpool(x):
    dims, strides, padcfg = (1, 1, 3, 3), (1, 1, 2, 2), ((0, 0), (0, 0), (1, 1), (1, 1))
    s = jax.lax.reduce_window(x, 0.0, jax.lax.add, dims, strides, padcfg)
    c = jax.lax.reduce_window(jnp.ones_like(x), 0.0, jax.lax.add, dims, strides, padcfg)
    return s / c


def _ref_forward(x, params, num_scales):
    outs = []
    for s in range(num_scales):
        h = x
        for layer in params[s][:-1]:
            h = _ref_conv(h, layer["w"], layer["b"], 2, 1)
            h = jnp.where(h >= 0, h, 0.2 * h)
        outs.append(_ref_conv(h, params[s][-1]["w"], params[s][-1]["b"], 1, 0))
        if num_scales > 1:
            x = _ref_avgpool(x)
    return outs


# ----------------------------------------------------------------------------
if __name__ == "__main__":
    # Module config: input_dim=4, n_layers=2, dim=8, num_scales=2,
    # norm='none', activation='lrelu', pad_type='zero', dimensions=2.
    input_dim, n_layers, dim, num_scales = 4, 2, 8, 2

    key = jax.random.PRNGKey(0)
    key, kx = jax.random.split(key)
    x = jax.random.normal(kx, (2, input_dim, 16, 16), jnp.float32)

    params = init_params(key, input_dim, n_layers, dim, num_scales)

    fwd = jax.jit(functools.partial(multiscale_forward, num_scales=num_scales))
    outs = fwd(x, params)
    outs = [jax.block_until_ready(o) for o in outs]

    refs = _ref_forward(x, params, num_scales)
    for o, r in zip(outs, refs):
        assert o.shape == r.shape, (o.shape, r.shape)
        # bf16 MXU inputs / bf16 inter-layer activations (f32 accumulation)
        # -> looser tolerance than pure f32.
        assert jnp.allclose(o, r, atol=2e-2, rtol=2e-2), float(jnp.max(jnp.abs(o - r)))

    print("KERNEL_OK")
</pallas_src>

<mosaic_0001>
module attributes {stable_mosaic.version = 11 : i64} {
  func.func @_conv_block_kernel(%arg0: i32, %arg1: memref<1x32x72xbf16, #tpu.memory_space<vmem>>, %arg2: memref<2x8x32xbf16, #tpu.memory_space<vmem>>, %arg3: memref<8x1xf32, #tpu.memory_space<vmem>>, %arg4: memref<1x8x64xbf16, #tpu.memory_space<vmem>>) attributes {dimension_semantics = [#tpu.dimension_semantics<parallel>], iteration_bounds = array<i64: 2>, scalar_prefetch = 0 : i64, scratch_operands = 0 : i64, tpu.core_type = #tpu.core_type<tc>, window_params = [{transform_indices = @transform_0, window_bounds = array<i64: 1, 32, 72>}, {pipeline_mode = #tpu.pipeline_mode<synchronous>, transform_indices = @transform_1, window_bounds = array<i64: 2, 8, 32>}, {pipeline_mode = #tpu.pipeline_mode<synchronous>, transform_indices = @transform_2, window_bounds = array<i64: 8, 1>}, {transform_indices = @transform_3, window_bounds = array<i64: 1, 8, 64>}]} {
    %c0 = arith.constant 0 : index
    %c0_0 = arith.constant 0 : index
    %c0_1 = arith.constant 0 : index
    %0 = vector.load %arg1[%c0, %c0_0, %c0_1] : memref<1x32x72xbf16, #tpu.memory_space<vmem>>, vector<1x32x72xbf16>
    %1 = vector.shape_cast %0 : vector<1x32x72xbf16> to vector<32x72xbf16>
    %c0_2 = arith.constant 0 : index
    %c0_3 = arith.constant 0 : index
    %c0_4 = arith.constant 0 : index
    %2 = vector.load %arg2[%c0_2, %c0_3, %c0_4] : memref<2x8x32xbf16, #tpu.memory_space<vmem>>, vector<1x8x32xbf16>
    %3 = vector.shape_cast %2 : vector<1x8x32xbf16> to vector<8x32xbf16>
    %4 = vector.extract_strided_slice %1 {offsets = [0, 0], sizes = [32, 64], strides = [1, 1]} : vector<32x72xbf16> to vector<32x64xbf16>
    %cst = arith.constant dense<0.000000e+00> : vector<8x64xf32>
    %5 = tpu.matmul %3, %4, %cst {dimension_numbers = #tpu.dot_dimension_numbers<[1], [0], [0], [1], [0, 0, 1, 1], [], []>} : vector<8x32xbf16>, vector<32x64xbf16>, vector<8x64xf32> -> vector<8x64xf32>
    %c1 = arith.constant 1 : index
    %c0_5 = arith.constant 0 : index
    %c0_6 = arith.constant 0 : index
    %6 = vector.load %arg2[%c1, %c0_5, %c0_6] : memref<2x8x32xbf16, #tpu.memory_space<vmem>>, vector<1x8x32xbf16>
    %7 = vector.shape_cast %6 : vector<1x8x32xbf16> to vector<8x32xbf16>
    %8 = vector.extract_strided_slice %1 {offsets = [0, 8], sizes = [32, 64], strides = [1, 1]} : vector<32x72xbf16> to vector<32x64xbf16>
    %cst_7 = arith.constant dense<0.000000e+00> : vector<8x64xf32>
    %9 = tpu.matmul %7, %8, %cst_7 {dimension_numbers = #tpu.dot_dimension_numbers<[1], [0], [0], [1], [0, 0, 1, 1], [], []>} : vector<8x32xbf16>, vector<32x64xbf16>, vector<8x64xf32> -> vector<8x64xf32>
    %10 = arith.addf %5, %9 : vector<8x64xf32>
    %c0_8 = arith.constant 0 : index
    %c0_9 = arith.constant 0 : index
    %11 = vector.load %arg3[%c0_8, %c0_9] : memref<8x1xf32, #tpu.memory_space<vmem>>, vector<8x1xf32>
    %12 = vector.broadcast %11 : vector<8x1xf32> to vector<8x64xf32>
    %13 = arith.addf %10, %12 : vector<8x64xf32>
    %cst_10 = arith.constant 0.000000e+00 : f32
    %14 = vector.broadcast %cst_10 : f32 to vector<8x64xf32>
    %15 = arith.cmpf oge, %13, %14 : vector<8x64xf32>
    %cst_11 = arith.constant 2.000000e-01 : f32
    %16 = vector.broadcast %cst_11 : f32 to vector<8x64xf32>
    %17 = arith.mulf %16, %13 : vector<8x64xf32>
    %18 = arith.select %15, %13, %17 : vector<8x64xi1>, vector<8x64xf32>
    %19 = arith.truncf %18 : vector<8x64xf32> to vector<8x64xbf16>
    %c0_12 = arith.constant 0 : index
    %c0_13 = arith.constant 0 : index
    %c0_14 = arith.constant 0 : index
    %20 = vector.load %arg4[%c0_12, %c0_13, %c0_14] : memref<1x8x64xbf16, #tpu.memory_space<vmem>>, vector<1x8x64xbf16>
    %21 = vector.shape_cast %20 : vector<1x8x64xbf16> to vector<8x64xbf16>
    %22 = vector.shape_cast %19 : vector<8x64xbf16> to vector<1x8x64xbf16>
    tpu.vector_store %arg4[%c0_12, %c0_13, %c0_14], %22 {strides = array<i32>} : memref<1x8x64xbf16, #tpu.memory_space<vmem>>, vector<1x8x64xbf16>,
    return
  }
  func.func @transform_0(%arg0: i32) -> (i32, i32, i32) {
    %c0_i32 = arith.constant 0 : i32
    %c0_i32_0 = arith.constant 0 : i32
    %c0_i32_1 = arith.constant 0 : i32
    return %arg0, %c0_i32, %c0_i32_0 : i32, i32, i32
  }
  func.func @transform_1(%arg0: i32) -> (i32, i32, i32) {
    %c0_i32 = arith.constant 0 : i32
    %c0_i32_0 = arith.constant 0 : i32
    %c0_i32_1 = arith.constant 0 : i32
    %c0_i32_2 = arith.constant 0 : i32
    return %c0_i32, %c0_i32_0, %c0_i32_1 : i32, i32, i32
  }
  func.func @transform_2(%arg0: i32) -> (i32, i32) {
    %c0_i32 = arith.constant 0 : i32
    %c0_i32_0 = arith.constant 0 : i32
    %c0_i32_1 = arith.constant 0 : i32
    return %c0_i32, %c0_i32_0 : i32, i32
  }
  func.func @transform_3(%arg0: i32) -> (i32, i32, i32) {
    %c0_i32 = arith.constant 0 : i32
    %c0_i32_0 = arith.constant 0 : i32
    %c0_i32_1 = arith.constant 0 : i32
    return %arg0, %c0_i32, %c0_i32_0 : i32, i32, i32
  }
}

module attributes {stable_mosaic.version = 11 : i64} {
  func.func @_conv_block_kernel(%arg0: i32, %arg1: memref<1x64x20xbf16, #tpu.memory_space<vmem>>, %arg2: memref<2x16x64xbf16, #tpu.memory_space<vmem>>, %arg3: memref<16x1xf32, #tpu.memory_space<vmem>>, %arg4: memref<1x16x16xbf16, #tpu.memory_space<vmem>>) attributes {dimension_semantics = [#tpu.dimension_semantics<parallel>], iteration_bounds = array<i64: 2>, scalar_prefetch = 0 : i64, scratch_operands = 0 : i64, tpu.core_type = #tpu.core_type<tc>, window_params = [{transform_indices = @transform_0, window_bounds = array<i64: 1, 64, 20>}, {pipeline_mode = #tpu.pipeline_mode<synchronous>, transform_indices = @transform_1, window_bounds = array<i64: 2, 16, 64>}, {pipeline_mode = #tpu.pipeline_mode<synchronous>, transform_indices = @transform_2, window_bounds = array<i64: 16, 1>}, {transform_indices = @transform_3, window_bounds = array<i64: 1, 16, 16>}]} {
    %c0 = arith.constant 0 : index
    %c0_0 = arith.constant 0 : index
    %c0_1 = arith.constant 0 : index
    %0 = vector.load %arg1[%c0, %c0_0, %c0_1] : memref<1x64x20xbf16, #tpu.memory_space<vmem>>, vector<1x64x20xbf16>
    %1 = vector.shape_cast %0 : vector<1x64x20xbf16> to vector<64x20xbf16>
    %c0_2 = arith.constant 0 : index
    %c0_3 = arith.constant 0 : index
    %c0_4 = arith.constant 0 : index
    %2 = vector.load %arg2[%c0_2, %c0_3, %c0_4] : memref<2x16x64xbf16, #tpu.memory_space<vmem>>, vector<1x16x64xbf16>
    %3 = vector.shape_cast %2 : vector<1x16x64xbf16> to vector<16x64xbf16>
    %4 = vector.extract_strided_slice %1 {offsets = [0, 0], sizes = [64, 16], strides = [1, 1]} : vector<64x20xbf16> to vector<64x16xbf16>
    %cst = arith.constant dense<0.000000e+00> : vector<16x16xf32>
    %5 = tpu.matmul %3, %4, %cst {dimension_numbers = #tpu.dot_dimension_numbers<[1], [0], [0], [1], [0, 0, 1, 1], [], []>} : vector<16x64xbf16>, vector<64x16xbf16>, vector<16x16xf32> -> vector<16x16xf32>
    %c1 = arith.constant 1 : index
    %c0_5 = arith.constant 0 : index
    %c0_6 = arith.constant 0 : index
    %6 = vector.load %arg2[%c1, %c0_5, %c0_6] : memref<2x16x64xbf16, #tpu.memory_space<vmem>>, vector<1x16x64xbf16>
    %7 = vector.shape_cast %6 : vector<1x16x64xbf16> to vector<16x64xbf16>
    %8 = vector.extract_strided_slice %1 {offsets = [0, 4], sizes = [64, 16], strides = [1, 1]} : vector<64x20xbf16> to vector<64x16xbf16>
    %cst_7 = arith.constant dense<0.000000e+00> : vector<16x16xf32>
    %9 = tpu.matmul %7, %8, %cst_7 {dimension_numbers = #tpu.dot_dimension_numbers<[1], [0], [0], [1], [0, 0, 1, 1], [], []>} : vector<16x64xbf16>, vector<64x16xbf16>, vector<16x16xf32> -> vector<16x16xf32>
    %10 = arith.addf %5, %9 : vector<16x16xf32>
    %c0_8 = arith.constant 0 : index
    %c0_9 = arith.constant 0 : index
    %11 = vector.load %arg3[%c0_8, %c0_9] : memref<16x1xf32, #tpu.memory_space<vmem>>, vector<16x1xf32>
    %12 = vector.broadcast %11 : vector<16x1xf32> to vector<16x16xf32>
    %13 = arith.addf %10, %12 : vector<16x16xf32>
    %cst_10 = arith.constant 0.000000e+00 : f32
    %14 = vector.broadcast %cst_10 : f32 to vector<16x16xf32>
    %15 = arith.cmpf oge, %13, %14 : vector<16x16xf32>
    %cst_11 = arith.constant 2.000000e-01 : f32
    %16 = vector.broadcast %cst_11 : f32 to vector<16x16xf32>
    %17 = arith.mulf %16, %13 : vector<16x16xf32>
    %18 = arith.select %15, %13, %17 : vector<16x16xi1>, vector<16x16xf32>
    %19 = arith.truncf %18 : vector<16x16xf32> to vector<16x16xbf16>
    %c0_12 = arith.constant 0 : index
    %c0_13 = arith.constant 0 : index
    %c0_14 = arith.constant 0 : index
    %20 = vector.load %arg4[%c0_12, %c0_13, %c0_14] : memref<1x16x16xbf16, #tpu.memory_space<vmem>>, vector<1x16x16xbf16>
    %21 = vector.shape_cast %20 : vector<1x16x16xbf16> to vector<16x16xbf16>
    %22 = vector.shape_cast %19 : vector<16x16xbf16> to vector<1x16x16xbf16>
    tpu.vector_store %arg4[%c0_12, %c0_13, %c0_14], %22 {strides = array<i32>} : memref<1x16x16xbf16, #tpu.memory_space<vmem>>, vector<1x16x16xbf16>,
    return
  }
  func.func @transform_0(%arg0: i32) -> (i32, i32, i32) {
    %c0_i32 = arith.constant 0 : i32
    %c0_i32_0 = arith.constant 0 : i32
    %c0_i32_1 = arith.constant 0 : i32
    return %arg0, %c0_i32, %c0_i32_0 : i32, i32, i32
  }
  func.func @transform_1(%arg0: i32) -> (i32, i32, i32) {
    %c0_i32 = arith.constant 0 : i32
    %c0_i32_0 = arith.constant 0 : i32
    %c0_i32_1 = arith.constant 0 : i32
    %c0_i32_2 = arith.constant 0 : i32
    return %c0_i32, %c0_i32_0, %c0_i32_1 : i32, i32, i32
  }
  func.func @transform_2(%arg0: i32) -> (i32, i32) {
    %c0_i32 = arith.constant 0 : i32
    %c0_i32_0 = arith.constant 0 : i32
    %c0_i32_1 = arith.constant 0 : i32
    return %c0_i32, %c0_i32_0 : i32, i32
  }
  func.func @transform_3(%arg0: i32) -> (i32, i32, i32) {
    %c0_i32 = arith.constant 0 : i32
    %c0_i32_0 = arith.constant 0 : i32
    %c0_i32_1 = arith.constant 0 : i32
    return %arg0, %c0_i32, %c0_i32_0 : i32, i32, i32
  }
}

module attributes {stable_mosaic.version = 11 : i64} {
  func.func @_conv1x1_kernel(%arg0: i32, %arg1: memref<1x16x16xbf16, #tpu.memory_space<vmem>>, %arg2: memref<1x16xbf16, #tpu.memory_space<vmem>>, %arg3: memref<1x1xf32, #tpu.memory_space<vmem>>, %arg4: memref<1x1x16xf32, #tpu.memory_space<vmem>>) attributes {dimension_semantics = [#tpu.dimension_semantics<parallel>], iteration_bounds = array<i64: 2>, scalar_prefetch = 0 : i64, scratch_operands = 0 : i64, tpu.core_type = #tpu.core_type<tc>, window_params = [{transform_indices = @transform_0, window_bounds = array<i64: 1, 16, 16>}, {pipeline_mode = #tpu.pipeline_mode<synchronous>, transform_indices = @transform_1, window_bounds = array<i64: 1, 16>}, {pipeline_mode = #tpu.pipeline_mode<synchronous>, transform_indices = @transform_2, window_bounds = array<i64: 1, 1>}, {transform_indices = @transform_3, window_bounds = array<i64: 1, 1, 16>}]} {
    %c0 = arith.constant 0 : index
    %c0_0 = arith.constant 0 : index
    %0 = vector.load %arg2[%c0, %c0_0] : memref<1x16xbf16, #tpu.memory_space<vmem>>, vector<1x16xbf16>
    %c0_1 = arith.constant 0 : index
    %c0_2 = arith.constant 0 : index
    %c0_3 = arith.constant 0 : index
    %1 = vector.load %arg1[%c0_1, %c0_2, %c0_3] : memref<1x16x16xbf16, #tpu.memory_space<vmem>>, vector<1x16x16xbf16>
    %2 = vector.shape_cast %1 : vector<1x16x16xbf16> to vector<16x16xbf16>
    %cst = arith.constant dense<0.000000e+00> : vector<1x16xf32>
    %3 = tpu.matmul %0, %2, %cst {dimension_numbers = #tpu.dot_dimension_numbers<[1], [0], [0], [1], [0, 0, 1, 1], [], []>} : vector<1x16xbf16>, vector<16x16xbf16>, vector<1x16xf32> -> vector<1x16xf32>
    %c0_4 = arith.constant 0 : index
    %c0_5 = arith.constant 0 : index
    %4 = vector.load %arg3[%c0_4, %c0_5] : memref<1x1xf32, #tpu.memory_space<vmem>>, vector<1x1xf32>
    %5 = vector.broadcast %4 : vector<1x1xf32> to vector<1x16xf32>
    %6 = arith.addf %3, %5 : vector<1x16xf32>
    %c0_6 = arith.constant 0 : index
    %c0_7 = arith.constant 0 : index
    %c0_8 = arith.constant 0 : index
    %7 = vector.load %arg4[%c0_6, %c0_7, %c0_8] : memref<1x1x16xf32, #tpu.memory_space<vmem>>, vector<1x1x16xf32>
    %8 = vector.shape_cast %7 : vector<1x1x16xf32> to vector<1x16xf32>
    %9 = vector.shape_cast %6 : vector<1x16xf32> to vector<1x1x16xf32>
    tpu.vector_store %arg4[%c0_6, %c0_7, %c0_8], %9 {strides = array<i32>} : memref<1x1x16xf32, #tpu.memory_space<vmem>>, vector<1x1x16xf32>,
    return
  }
  func.func @transform_0(%arg0: i32) -> (i32, i32, i32) {
    %c0_i32 = arith.constant 0 : i32
    %c0_i32_0 = arith.constant 0 : i32
    %c0_i32_1 = arith.constant 0 : i32
    return %arg0, %c0_i32, %c0_i32_0 : i32, i32, i32
  }
  func.func @transform_1(%arg0: i32) -> (i32, i32) {
    %c0_i32 = arith.constant 0 : i32
    %c0_i32_0 = arith.constant 0 : i32
    %c0_i32_1 = arith.constant 0 : i32
    return %c0_i32, %c0_i32_0 : i32, i32
  }
  func.func @transform_2(%arg0: i32) -> (i32, i32) {
    %c0_i32 = arith.constant 0 : i32
    %c0_i32_0 = arith.constant 0 : i32
    %c0_i32_1 = arith.constant 0 : i32
    return %c0_i32, %c0_i32_0 : i32, i32
  }
  func.func @transform_3(%arg0: i32) -> (i32, i32, i32) {
    %c0_i32 = arith.constant 0 : i32
    %c0_i32_0 = arith.constant 0 : i32
    %c0_i32_1 = arith.constant 0 : i32
    return %arg0, %c0_i32, %c0_i32_0 : i32, i32, i32
  }
}

module attributes {stable_mosaic.version = 11 : i64} {
  func.func @_avgpool_kernel(%arg0: i32, %arg1: memref<1x6x4x72xbf16, #tpu.memory_space<vmem>>, %arg2: memref<1x64xf32, #tpu.memory_space<vmem>>, %arg3: memref<1x4x64xbf16, #tpu.memory_space<vmem>>) attributes {dimension_semantics = [#tpu.dimension_semantics<parallel>], iteration_bounds = array<i64: 2>, scalar_prefetch = 0 : i64, scratch_operands = 0 : i64, tpu.core_type = #tpu.core_type<tc>, window_params = [{transform_indices = @transform_0, window_bounds = array<i64: 1, 6, 4, 72>}, {pipeline_mode = #tpu.pipeline_mode<synchronous>, transform_indices = @transform_1, window_bounds = array<i64: 1, 64>}, {transform_indices = @transform_2, window_bounds = array<i64: 1, 4, 64>}]} {
    %c0 = arith.constant 0 : index
    %c0_0 = arith.constant 0 : index
    %c0_1 = arith.constant 0 : index
    %c0_2 = arith.constant 0 : index
    %0 = vector.load %arg1[%c0, %c0_0, %c0_1, %c0_2] : memref<1x6x4x72xbf16, #tpu.memory_space<vmem>>, vector<1x6x4x72xbf16>
    %1 = vector.shape_cast %0 : vector<1x6x4x72xbf16> to vector<6x4x72xbf16>
    %2 = vector.extract_strided_slice %1 {offsets = [0, 0, 0], sizes = [1, 4, 64], strides = [1, 1, 1]} : vector<6x4x72xbf16> to vector<1x4x64xbf16>
    %3 = vector.shape_cast %2 : vector<1x4x64xbf16> to vector<4x64xbf16>
    %4 = arith.extf %3 : vector<4x64xbf16> to vector<4x64xf32>
    %5 = vector.extract_strided_slice %1 {offsets = [1, 0, 0], sizes = [1, 4, 64], strides = [1, 1, 1]} : vector<6x4x72xbf16> to vector<1x4x64xbf16>
    %6 = vector.shape_cast %5 : vector<1x4x64xbf16> to vector<4x64xbf16>
    %7 = arith.extf %6 : vector<4x64xbf16> to vector<4x64xf32>
    %8 = arith.addf %4, %7 : vector<4x64xf32>
    %9 = vector.extract_strided_slice %1 {offsets = [2, 0, 0], sizes = [1, 4, 64], strides = [1, 1, 1]} : vector<6x4x72xbf16> to vector<1x4x64xbf16>
    %10 = vector.shape_cast %9 : vector<1x4x64xbf16> to vector<4x64xbf16>
    %11 = arith.extf %10 : vector<4x64xbf16> to vector<4x64xf32>
    %12 = arith.addf %8, %11 : vector<4x64xf32>
    %13 = vector.extract_strided_slice %1 {offsets = [3, 0, 0], sizes = [1, 4, 64], strides = [1, 1, 1]} : vector<6x4x72xbf16> to vector<1x4x64xbf16>
    %14 = vector.shape_cast %13 : vector<1x4x64xbf16> to vector<4x64xbf16>
    %15 = arith.extf %14 : vector<4x64xbf16> to vector<4x64xf32>
    %16 = arith.addf %12, %15 : vector<4x64xf32>
    %17 = vector.extract_strided_slice %1 {offsets = [4, 0, 0], sizes = [1, 4, 64], strides = [1, 1, 1]} : vector<6x4x72xbf16> to vector<1x4x64xbf16>
    %18 = vector.shape_cast %17 : vector<1x4x64xbf16> to vector<4x64xbf16>
    %19 = arith.extf %18 : vector<4x64xbf16> to vector<4x64xf32>
    %20 = arith.addf %16, %19 : vector<4x64xf32>
    %21 = vector.extract_strided_slice %1 {offsets = [5, 0, 0], sizes = [1, 4, 64], strides = [1, 1, 1]} : vector<6x4x72xbf16> to vector<1x4x64xbf16>
    %22 = vector.shape_cast %21 : vector<1x4x64xbf16> to vector<4x64xbf16>
    %23 = arith.extf %22 : vector<4x64xbf16> to vector<4x64xf32>
    %24 = arith.addf %20, %23 : vector<4x64xf32>
    %25 = vector.extract_strided_slice %1 {offsets = [0, 0, 8], sizes = [1, 4, 64], strides = [1, 1, 1]} : vector<6x4x72xbf16> to vector<1x4x64xbf16>
    %26 = vector.shape_cast %25 : vector<1x4x64xbf16> to vector<4x64xbf16>
    %27 = arith.extf %26 : vector<4x64xbf16> to vector<4x64xf32>
    %28 = arith.addf %24, %27 : vector<4x64xf32>
    %29 = vector.extract_strided_slice %1 {offsets = [1, 0, 8], sizes = [1, 4, 64], strides = [1, 1, 1]} : vector<6x4x72xbf16> to vector<1x4x64xbf16>
    %30 = vector.shape_cast %29 : vector<1x4x64xbf16> to vector<4x64xbf16>
    %31 = arith.extf %30 : vector<4x64xbf16> to vector<4x64xf32>
    %32 = arith.addf %28, %31 : vector<4x64xf32>
    %33 = vector.extract_strided_slice %1 {offsets = [2, 0, 8], sizes = [1, 4, 64], strides = [1, 1, 1]} : vector<6x4x72xbf16> to vector<1x4x64xbf16>
    %34 = vector.shape_cast %33 : vector<1x4x64xbf16> to vector<4x64xbf16>
    %35 = arith.extf %34 : vector<4x64xbf16> to vector<4x64xf32>
    %36 = arith.addf %32, %35 : vector<4x64xf32>
    %c0_3 = arith.constant 0 : index
    %c0_4 = arith.constant 0 : index
    %37 = vector.load %arg2[%c0_3, %c0_4] : memref<1x64xf32, #tpu.memory_space<vmem>>, vector<1x64xf32>
    %38 = vector.broadcast %37 : vector<1x64xf32> to vector<4x64xf32>
    %39 = arith.mulf %36, %38 : vector<4x64xf32>
    %40 = arith.truncf %39 : vector<4x64xf32> to vector<4x64xbf16>
    %c0_5 = arith.constant 0 : index
    %c0_6 = arith.constant 0 : index
    %c0_7 = arith.constant 0 : index
    %41 = vector.load %arg3[%c0_5, %c0_6, %c0_7] : memref<1x4x64xbf16, #tpu.memory_space<vmem>>, vector<1x4x64xbf16>
    %42 = vector.shape_cast %41 : vector<1x4x64xbf16> to vector<4x64xbf16>
    %43 = vector.shape_cast %40 : vector<4x64xbf16> to vector<1x4x64xbf16>
    tpu.vector_store %arg3[%c0_5, %c0_6, %c0_7], %43 {strides = array<i32>} : memref<1x4x64xbf16, #tpu.memory_space<vmem>>, vector<1x4x64xbf16>,
    return
  }
  func.func @transform_0(%arg0: i32) -> (i32, i32, i32, i32) {
    %c0_i32 = arith.constant 0 : i32
    %c0_i32_0 = arith.constant 0 : i32
    %c0_i32_1 = arith.constant 0 : i32
    %c0_i32_2 = arith.constant 0 : i32
    return %arg0, %c0_i32, %c0_i32_0, %c0_i32_1 : i32, i32, i32, i32
  }
  func.func @transform_1(%arg0: i32) -> (i32, i32) {
    %c0_i32 = arith.constant 0 : i32
    %c0_i32_0 = arith.constant 0 : i32
    %c0_i32_1 = arith.constant 0 : i32
    return %c0_i32, %c0_i32_0 : i32, i32
  }
  func.func @transform_2(%arg0: i32) -> (i32, i32, i32) {
    %c0_i32 = arith.constant 0 : i32
    %c0_i32_0 = arith.constant 0 : i32
    %c0_i32_1 = arith.constant 0 : i32
    return %arg0, %c0_i32, %c0_i32_0 : i32, i32, i32
  }
}

module attributes {stable_mosaic.version = 11 : i64} {
  func.func @_conv_block_kernel(%arg0: i32, %arg1: memref<1x32x20xbf16, #tpu.memory_space<vmem>>, %arg2: memref<2x8x32xbf16, #tpu.memory_space<vmem>>, %arg3: memref<8x1xf32, #tpu.memory_space<vmem>>, %arg4: memref<1x8x16xbf16, #tpu.memory_space<vmem>>) attributes {dimension_semantics = [#tpu.dimension_semantics<parallel>], iteration_bounds = array<i64: 2>, scalar_prefetch = 0 : i64, scratch_operands = 0 : i64, tpu.core_type = #tpu.core_type<tc>, window_params = [{transform_indices = @transform_0, window_bounds = array<i64: 1, 32, 20>}, {pipeline_mode = #tpu.pipeline_mode<synchronous>, transform_indices = @transform_1, window_bounds = array<i64: 2, 8, 32>}, {pipeline_mode = #tpu.pipeline_mode<synchronous>, transform_indices = @transform_2, window_bounds = array<i64: 8, 1>}, {transform_indices = @transform_3, window_bounds = array<i64: 1, 8, 16>}]} {
    %c0 = arith.constant 0 : index
    %c0_0 = arith.constant 0 : index
    %c0_1 = arith.constant 0 : index
    %0 = vector.load %arg1[%c0, %c0_0, %c0_1] : memref<1x32x20xbf16, #tpu.memory_space<vmem>>, vector<1x32x20xbf16>
    %1 = vector.shape_cast %0 : vector<1x32x20xbf16> to vector<32x20xbf16>
    %c0_2 = arith.constant 0 : index
    %c0_3 = arith.constant 0 : index
    %c0_4 = arith.constant 0 : index
    %2 = vector.load %arg2[%c0_2, %c0_3, %c0_4] : memref<2x8x32xbf16, #tpu.memory_space<vmem>>, vector<1x8x32xbf16>
    %3 = vector.shape_cast %2 : vector<1x8x32xbf16> to vector<8x32xbf16>
    %4 = vector.extract_strided_slice %1 {offsets = [0, 0], sizes = [32, 16], strides = [1, 1]} : vector<32x20xbf16> to vector<32x16xbf16>
    %cst = arith.constant dense<0.000000e+00> : vector<8x16xf32>
    %5 = tpu.matmul %3, %4, %cst {dimension_numbers = #tpu.dot_dimension_numbers<[1], [0], [0], [1], [0, 0, 1, 1], [], []>} : vector<8x32xbf16>, vector<32x16xbf16>, vector<8x16xf32> -> vector<8x16xf32>
    %c1 = arith.constant 1 : index
    %c0_5 = arith.constant 0 : index
    %c0_6 = arith.constant 0 : index
    %6 = vector.load %arg2[%c1, %c0_5, %c0_6] : memref<2x8x32xbf16, #tpu.memory_space<vmem>>, vector<1x8x32xbf16>
    %7 = vector.shape_cast %6 : vector<1x8x32xbf16> to vector<8x32xbf16>
    %8 = vector.extract_strided_slice %1 {offsets = [0, 4], sizes = [32, 16], strides = [1, 1]} : vector<32x20xbf16> to vector<32x16xbf16>
    %cst_7 = arith.constant dense<0.000000e+00> : vector<8x16xf32>
    %9 = tpu.matmul %7, %8, %cst_7 {dimension_numbers = #tpu.dot_dimension_numbers<[1], [0], [0], [1], [0, 0, 1, 1], [], []>} : vector<8x32xbf16>, vector<32x16xbf16>, vector<8x16xf32> -> vector<8x16xf32>
    %10 = arith.addf %5, %9 : vector<8x16xf32>
    %c0_8 = arith.constant 0 : index
    %c0_9 = arith.constant 0 : index
    %11 = vector.load %arg3[%c0_8, %c0_9] : memref<8x1xf32, #tpu.memory_space<vmem>>, vector<8x1xf32>
    %12 = vector.broadcast %11 : vector<8x1xf32> to vector<8x16xf32>
    %13 = arith.addf %10, %12 : vector<8x16xf32>
    %cst_10 = arith.constant 0.000000e+00 : f32
    %14 = vector.broadcast %cst_10 : f32 to vector<8x16xf32>
    %15 = arith.cmpf oge, %13, %14 : vector<8x16xf32>
    %cst_11 = arith.constant 2.000000e-01 : f32
    %16 = vector.broadcast %cst_11 : f32 to vector<8x16xf32>
    %17 = arith.mulf %16, %13 : vector<8x16xf32>
    %18 = arith.select %15, %13, %17 : vector<8x16xi1>, vector<8x16xf32>
    %19 = arith.truncf %18 : vector<8x16xf32> to vector<8x16xbf16>
    %c0_12 = arith.constant 0 : index
    %c0_13 = arith.constant 0 : index
    %c0_14 = arith.constant 0 : index
    %20 = vector.load %arg4[%c0_12, %c0_13, %c0_14] : memref<1x8x16xbf16, #tpu.memory_space<vmem>>, vector<1x8x16xbf16>
    %21 = vector.shape_cast %20 : vector<1x8x16xbf16> to vector<8x16xbf16>
    %22 = vector.shape_cast %19 : vector<8x16xbf16> to vector<1x8x16xbf16>
    tpu.vector_store %arg4[%c0_12, %c0_13, %c0_14], %22 {strides = array<i32>} : memref<1x8x16xbf16, #tpu.memory_space<vmem>>, vector<1x8x16xbf16>,
    return
  }
  func.func @transform_0(%arg0: i32) -> (i32, i32, i32) {
    %c0_i32 = arith.constant 0 : i32
    %c0_i32_0 = arith.constant 0 : i32
    %c0_i32_1 = arith.constant 0 : i32
    return %arg0, %c0_i32, %c0_i32_0 : i32, i32, i32
  }
  func.func @transform_1(%arg0: i32) -> (i32, i32, i32) {
    %c0_i32 = arith.constant 0 : i32
    %c0_i32_0 = arith.constant 0 : i32
    %c0_i32_1 = arith.constant 0 : i32
    %c0_i32_2 = arith.constant 0 : i32
    return %c0_i32, %c0_i32_0, %c0_i32_1 : i32, i32, i32
  }
  func.func @transform_2(%arg0: i32) -> (i32, i32) {
    %c0_i32 = arith.constant 0 : i32
    %c0_i32_0 = arith.constant 0 : i32
    %c0_i32_1 = arith.constant 0 : i32
    return %c0_i32, %c0_i32_0 : i32, i32
  }
  func.func @transform_3(%arg0: i32) -> (i32, i32, i32) {
    %c0_i32 = arith.constant 0 : i32
    %c0_i32_0 = arith.constant 0 : i32
    %c0_i32_1 = arith.constant 0 : i32
    return %arg0, %c0_i32, %c0_i32_0 : i32, i32, i32
  }
}

module attributes {stable_mosaic.version = 11 : i64} {
  func.func @_conv_block_kernel(%arg0: i32, %arg1: memref<1x64x6xbf16, #tpu.memory_space<vmem>>, %arg2: memref<2x16x64xbf16, #tpu.memory_space<vmem>>, %arg3: memref<16x1xf32, #tpu.memory_space<vmem>>, %arg4: memref<1x16x4xbf16, #tpu.memory_space<vmem>>) attributes {dimension_semantics = [#tpu.dimension_semantics<parallel>], iteration_bounds = array<i64: 2>, scalar_prefetch = 0 : i64, scratch_operands = 0 : i64, tpu.core_type = #tpu.core_type<tc>, window_params = [{transform_indices = @transform_0, window_bounds = array<i64: 1, 64, 6>}, {pipeline_mode = #tpu.pipeline_mode<synchronous>, transform_indices = @transform_1, window_bounds = array<i64: 2, 16, 64>}, {pipeline_mode = #tpu.pipeline_mode<synchronous>, transform_indices = @transform_2, window_bounds = array<i64: 16, 1>}, {transform_indices = @transform_3, window_bounds = array<i64: 1, 16, 4>}]} {
    %c0 = arith.constant 0 : index
    %c0_0 = arith.constant 0 : index
    %c0_1 = arith.constant 0 : index
    %0 = vector.load %arg1[%c0, %c0_0, %c0_1] : memref<1x64x6xbf16, #tpu.memory_space<vmem>>, vector<1x64x6xbf16>
    %1 = vector.shape_cast %0 : vector<1x64x6xbf16> to vector<64x6xbf16>
    %c0_2 = arith.constant 0 : index
    %c0_3 = arith.constant 0 : index
    %c0_4 = arith.constant 0 : index
    %2 = vector.load %arg2[%c0_2, %c0_3, %c0_4] : memref<2x16x64xbf16, #tpu.memory_space<vmem>>, vector<1x16x64xbf16>
    %3 = vector.shape_cast %2 : vector<1x16x64xbf16> to vector<16x64xbf16>
    %4 = vector.extract_strided_slice %1 {offsets = [0, 0], sizes = [64, 4], strides = [1, 1]} : vector<64x6xbf16> to vector<64x4xbf16>
    %cst = arith.constant dense<0.000000e+00> : vector<16x4xf32>
    %5 = tpu.matmul %3, %4, %cst {dimension_numbers = #tpu.dot_dimension_numbers<[1], [0], [0], [1], [0, 0, 1, 1], [], []>} : vector<16x64xbf16>, vector<64x4xbf16>, vector<16x4xf32> -> vector<16x4xf32>
    %c1 = arith.constant 1 : index
    %c0_5 = arith.constant 0 : index
    %c0_6 = arith.constant 0 : index
    %6 = vector.load %arg2[%c1, %c0_5, %c0_6] : memref<2x16x64xbf16, #tpu.memory_space<vmem>>, vector<1x16x64xbf16>
    %7 = vector.shape_cast %6 : vector<1x16x64xbf16> to vector<16x64xbf16>
    %8 = vector.extract_strided_slice %1 {offsets = [0, 2], sizes = [64, 4], strides = [1, 1]} : vector<64x6xbf16> to vector<64x4xbf16>
    %cst_7 = arith.constant dense<0.000000e+00> : vector<16x4xf32>
    %9 = tpu.matmul %7, %8, %cst_7 {dimension_numbers = #tpu.dot_dimension_numbers<[1], [0], [0], [1], [0, 0, 1, 1], [], []>} : vector<16x64xbf16>, vector<64x4xbf16>, vector<16x4xf32> -> vector<16x4xf32>
    %10 = arith.addf %5, %9 : vector<16x4xf32>
    %c0_8 = arith.constant 0 : index
    %c0_9 = arith.constant 0 : index
    %11 = vector.load %arg3[%c0_8, %c0_9] : memref<16x1xf32, #tpu.memory_space<vmem>>, vector<16x1xf32>
    %12 = vector.broadcast %11 : vector<16x1xf32> to vector<16x4xf32>
    %13 = arith.addf %10, %12 : vector<16x4xf32>
    %cst_10 = arith.constant 0.000000e+00 : f32
    %14 = vector.broadcast %cst_10 : f32 to vector<16x4xf32>
    %15 = arith.cmpf oge, %13, %14 : vector<16x4xf32>
    %cst_11 = arith.constant 2.000000e-01 : f32
    %16 = vector.broadcast %cst_11 : f32 to vector<16x4xf32>
    %17 = arith.mulf %16, %13 : vector<16x4xf32>
    %18 = arith.select %15, %13, %17 : vector<16x4xi1>, vector<16x4xf32>
    %19 = arith.truncf %18 : vector<16x4xf32> to vector<16x4xbf16>
    %c0_12 = arith.constant 0 : index
    %c0_13 = arith.constant 0 : index
    %c0_14 = arith.constant 0 : index
    %20 = vector.load %arg4[%c0_12, %c0_13, %c0_14] : memref<1x16x4xbf16, #tpu.memory_space<vmem>>, vector<1x16x4xbf16>
    %21 = vector.shape_cast %20 : vector<1x16x4xbf16> to vector<16x4xbf16>
    %22 = vector.shape_cast %19 : vector<16x4xbf16> to vector<1x16x4xbf16>
    tpu.vector_store %arg4[%c0_12, %c0_13, %c0_14], %22 {strides = array<i32>} : memref<1x16x4xbf16, #tpu.memory_space<vmem>>, vector<1x16x4xbf16>,
    return
  }
  func.func @transform_0(%arg0: i32) -> (i32, i32, i32) {
    %c0_i32 = arith.constant 0 : i32
    %c0_i32_0 = arith.constant 0 : i32
    %c0_i32_1 = arith.constant 0 : i32
    return %arg0, %c0_i32, %c0_i32_0 : i32, i32, i32
  }
  func.func @transform_1(%arg0: i32) -> (i32, i32, i32) {
    %c0_i32 = arith.constant 0 : i32
    %c0_i32_0 = arith.constant 0 : i32
    %c0_i32_1 = arith.constant 0 : i32
    %c0_i32_2 = arith.constant 0 : i32
    return %c0_i32, %c0_i32_0, %c0_i32_1 : i32, i32, i32
  }
  func.func @transform_2(%arg0: i32) -> (i32, i32) {
    %c0_i32 = arith.constant 0 : i32
    %c0_i32_0 = arith.constant 0 : i32
    %c0_i32_1 = arith.constant 0 : i32
    return %c0_i32, %c0_i32_0 : i32, i32
  }
  func.func @transform_3(%arg0: i32) -> (i32, i32, i32) {
    %c0_i32 = arith.constant 0 : i32
    %c0_i32_0 = arith.constant 0 : i32
    %c0_i32_1 = arith.constant 0 : i32
    return %arg0, %c0_i32, %c0_i32_0 : i32, i32, i32
  }
}

module attributes {stable_mosaic.version = 11 : i64} {
  func.func @_conv1x1_kernel(%arg0: i32, %arg1: memref<1x16x4xbf16, #tpu.memory_space<vmem>>, %arg2: memref<1x16xbf16, #tpu.memory_space<vmem>>, %arg3: memref<1x1xf32, #tpu.memory_space<vmem>>, %arg4: memref<1x1x4xf32, #tpu.memory_space<vmem>>) attributes {dimension_semantics = [#tpu.dimension_semantics<parallel>], iteration_bounds = array<i64: 2>, scalar_prefetch = 0 : i64, scratch_operands = 0 : i64, tpu.core_type = #tpu.core_type<tc>, window_params = [{transform_indices = @transform_0, window_bounds = array<i64: 1, 16, 4>}, {pipeline_mode = #tpu.pipeline_mode<synchronous>, transform_indices = @transform_1, window_bounds = array<i64: 1, 16>}, {pipeline_mode = #tpu.pipeline_mode<synchronous>, transform_indices = @transform_2, window_bounds = array<i64: 1, 1>}, {transform_indices = @transform_3, window_bounds = array<i64: 1, 1, 4>}]} {
    %c0 = arith.constant 0 : index
    %c0_0 = arith.constant 0 : index
    %0 = vector.load %arg2[%c0, %c0_0] : memref<1x16xbf16, #tpu.memory_space<vmem>>, vector<1x16xbf16>
    %c0_1 = arith.constant 0 : index
    %c0_2 = arith.constant 0 : index
    %c0_3 = arith.constant 0 : index
    %1 = vector.load %arg1[%c0_1, %c0_2, %c0_3] : memref<1x16x4xbf16, #tpu.memory_space<vmem>>, vector<1x16x4xbf16>
    %2 = vector.shape_cast %1 : vector<1x16x4xbf16> to vector<16x4xbf16>
    %cst = arith.constant dense<0.000000e+00> : vector<1x4xf32>
    %3 = tpu.matmul %0, %2, %cst {dimension_numbers = #tpu.dot_dimension_numbers<[1], [0], [0], [1], [0, 0, 1, 1], [], []>} : vector<1x16xbf16>, vector<16x4xbf16>, vector<1x4xf32> -> vector<1x4xf32>
    %c0_4 = arith.constant 0 : index
    %c0_5 = arith.constant 0 : index
    %4 = vector.load %arg3[%c0_4, %c0_5] : memref<1x1xf32, #tpu.memory_space<vmem>>, vector<1x1xf32>
    %5 = vector.broadcast %4 : vector<1x1xf32> to vector<1x4xf32>
    %6 = arith.addf %3, %5 : vector<1x4xf32>
    %c0_6 = arith.constant 0 : index
    %c0_7 = arith.constant 0 : index
    %c0_8 = arith.constant 0 : index
    %7 = vector.load %arg4[%c0_6, %c0_7, %c0_8] : memref<1x1x4xf32, #tpu.memory_space<vmem>>, vector<1x1x4xf32>
    %8 = vector.shape_cast %7 : vector<1x1x4xf32> to vector<1x4xf32>
    %9 = vector.shape_cast %6 : vector<1x4xf32> to vector<1x1x4xf32>
    tpu.vector_store %arg4[%c0_6, %c0_7, %c0_8], %9 {strides = array<i32>} : memref<1x1x4xf32, #tpu.memory_space<vmem>>, vector<1x1x4xf32>,
    return
  }
  func.func @transform_0(%arg0: i32) -> (i32, i32, i32) {
    %c0_i32 = arith.constant 0 : i32
    %c0_i32_0 = arith.constant 0 : i32
    %c0_i32_1 = arith.constant 0 : i32
    return %arg0, %c0_i32, %c0_i32_0 : i32, i32, i32
  }
  func.func @transform_1(%arg0: i32) -> (i32, i32) {
    %c0_i32 = arith.constant 0 : i32
    %c0_i32_0 = arith.constant 0 : i32
    %c0_i32_1 = arith.constant 0 : i32
    return %c0_i32, %c0_i32_0 : i32, i32
  }
  func.func @transform_2(%arg0: i32) -> (i32, i32) {
    %c0_i32 = arith.constant 0 : i32
    %c0_i32_0 = arith.constant 0 : i32
    %c0_i32_1 = arith.constant 0 : i32
    return %c0_i32, %c0_i32_0 : i32, i32
  }
  func.func @transform_3(%arg0: i32) -> (i32, i32, i32) {
    %c0_i32 = arith.constant 0 : i32
    %c0_i32_0 = arith.constant 0 : i32
    %c0_i32_1 = arith.constant 0 : i32
    return %arg0, %c0_i32, %c0_i32_0 : i32, i32, i32
  }
}

</mosaic_0001>

<bundles_post_ra>
// kernel: multiscale_forward.7
= control target key start
LH: loop header
LB: loop body
LE: loop exit
PB: predicated region body
PF: predicated region fallthrough
CT: control target
= control target key end

     0   :  { %s434_s12 = smov 0   ;;  %s464_s0 = inlined_call_operand.vmem [shape: bf16[2,32,72], index: 0, kind: input, shape index: {}]   ;;  %s465_s1 = inlined_call_operand.vmem [shape: bf16[2,8,32], index: 1, kind: input, shape index: {}]   ;;  %s466_s2 = inlined_call_operand.vmem [shape: f32[8,1], index: 2, kind: input, shape index: {}]   ;;  %s467_s3 = inlined_call_operand.vmem [shape: bf16[2,8,64], index: 3, kind: output, shape index: {}]  }
   0x1 LB: > { %s348_s13 = sadd.s32 4294967295, %s408_s12   ;;  %p352_p0 = scmp.ge.s32.totalorder %s408_s12, 1  ;;  %s408_s12 = sphi %s434_s12, %s13_s12  }
   0x2   : > { %p137_p1 = scmp.lt.s32.totalorder %s408_s12, 3 }
   0x4   : > { %p138_p2 = pnand %p352_p0, %p137_p1 }
   0x5   : > { %p160_p3 = scmp.lt.s32.totalorder (!%p138_p2), %s348_s13, 1  ;;  %v410_v0 = vmov (!%p138_p2), 0.0   ;;  %vm411_vm0 = vmmov (!%p138_p2), 0   ;;  %v282_v1 = vld [vmem:[%s466_s2] sm:$0xff] (!%p138_p2)  ;;  %v412_v2 = vmov (!%p138_p2), 0   ;;  %s413_s20 = smov (!%p138_p2), 120  }
   0x6   : > { %141 = sbr.rel (%p138_p2) target bundleno = 361 (0x169), region = 32  ;;  %378 = vmatprep.subr.bf16.mxu1 (!%p138_p2), %v410_v0  ;;  %370 = vmatprep.subr.bf16.mxu0 (!%p138_p2), %v410_v0  ;;  %v174_v5 = vld [vmem:[%s465_s1] sm:$0xf] (!%p138_p2)  ;;  %vm193_vm1 = vcmask (!%p138_p2), 261120   ;;  %v356_v8 = vld [vmem:[%s465_s1 + $0x4] sm:$0xf] (!%p138_p2) }
   0x7   : > { %382 = vmatprep.mubr.msk.bf16.mxu1 (!%p138_p2), %vm411_vm0, %v410_v0  ;;  %374 = vmatprep.mubr.msk.bf16.mxu0 (!%p138_p2), %vm411_vm0, %v410_v0  ;;  %vm293_vm3 = vcmask (!%p138_p2), 519168  }
   0x8   : > { %398 = vset.pattern.permute.xlu1 (!%p138_p2), %v412_v2  ;;  %399 = vset.pattern.permute.xlu0 (!%p138_p2), %v412_v2 }
   0x9   : > { %285 = vperm.xlu1 (!%p138_p2), %398, %v282_v1  }
   0xd   : > { %s469_s13 = smov (!%p160_p3, %s348_s13), 1 }
   0xe   : > { %s363_s16 = sshll.u32 %s469_s13, 4  ;;  %s355_s25 = sshll.u32 %s469_s13, 2 }
   0xf   : > { %s164_s19 = scalar_lea.vmem %s464_s0, %s363_s16  ;;  %s168_s28 = scalar_lea.vmem %s467_s3, %s355_s25 }
  0x10   : > { %v400_v3 = vld [vmem:[%s164_s19] sm:$0xff]   ;;  %v401_v4 = vld [vmem:[%s164_s19 + $0x8] sm:$0xff]  }
  0x11   : > { %187 = vrot.lane.b32.xlu0 %v400_v3, %s413_s20  ;;  %379 = vmatpush3.bf16.msra.mxu1 %v400_v3 }
  0x12   : > { %380 = vmatprep.subr.bf16.mxu1 %v410_v0 }
  0x15   : > { %189 = vrot.lane.b32.xlu0 %v401_v4, %s413_s20  ;;  %381 = vmatpush3.bf16.msra.mxu1 %v401_v4 }
  0x18   : > { %383 = vmatmul.mubr.msk.bf16.vlgmr.msra.gmra.mrb[0].mxu1 %vm193_vm1, %v174_v5 }
  0x83   : > { %v188_v6 = vpop.permute.xlu0 %187 }
  0x84   : > { %371 = vmatpush3.bf16.msra.mxu0 %v188_v6 }
  0x85   : > { %372 = vmatprep.subr.bf16.mxu0 %v410_v0 }
  0x87   : > { %v190_v7 = vpop.permute.xlu0 %189 }
  0x88   : > { %373 = vmatpush3.bf16.msra.mxu0 %v190_v7  ;;  %v286_v14 = vpop.permute.xlu1 %285 }
  0x8b   : > { %375 = vmatmul.mubr.msk.bf16.vlgmr.msra.gmra.mrb[0].mxu0 %vm193_vm1, %v356_v8 }
  0xeb   : > { %v276_v9 = vpop.f32.mrb[0].mxu1 }
  0xec   : > { %v384_v10 = vpop.f32.mrb[1].mxu1 }
  0xed   : > { %v279_v11 = vpop.f32.mrb[2].mxu1 }
  0xee   : > { %v385_v12 = vpop.f32.mrb[3].mxu1 }
 0x15e   : > { %v231_v13 = vpop.f32.mrb[0].mxu0 }
 0x15f   : > { %v277_v15 = vadd.f32 %v276_v9, %v231_v13  ;;  %v376_v16 = vpop.f32.mrb[1].mxu0 }
 0x160   : > { %v234_v17 = vpop.f32.mrb[2].mxu0 }
 0x161   : > { %v288_v18 = vadd.f32 %v286_v14, %v277_v15  ;;  %v377_v19 = vpop.f32.mrb[3].mxu0 }
 0x163   : > { %vm289_vm2 = vcmp.ge.f32.partialorder %v288_v18, 0.0  ;;  %v290_v20 = vmul.f32 0.2, %v288_v18 }
 0x165   : > { %v291_v21 = vsel %vm289_vm2, %v288_v18, %v290_v20 }
 0x166   : > { %v292_v22 = vpack.c.bf16 %v291_v21, %v291_v21 }
 0x168   : > { %294 = vst.msk [vmem:[%s168_s28] sm:$0xf] %vm293_vm3, %v292_v22 }
 0x169 PF: > { %s13_s12 = sadd.s32 1, %s408_s12  }
 0x16a   : > { %p10_p4 = scmp.ge.s32.totalorder %s13_s12, 4  }
 0x16c   :  { %12 = sbr.rel (!%p10_p4) target bundleno = 1 (0x1), region = 63 }

// kernel: multiscale_forward.9
= control target key start
LH: loop header
LB: loop body
LE: loop exit
PB: predicated region body
PF: predicated region fallthrough
CT: control target
= control target key end

     0   :  { %s349_s14 = smov 0   ;;  %s369_s0 = inlined_call_operand.vmem [shape: bf16[2,16,16], index: 0, kind: input, shape index: {}]   ;;  %s370_s1 = inlined_call_operand.vmem [shape: bf16[1,16], index: 1, kind: input, shape index: {}]   ;;  %s371_s2 = inlined_call_operand.<no memory space> [shape: f32[1,1], index: 2, kind: input, shape index: {}]   ;;  %s372_s3 = inlined_call_operand.vmem [shape: f32[2,1,16], index: 3, kind: output, shape index: {}]  }
   0x1   :  { %v8_v0 = vstv %s371_s2 }
   0x2   :  { %9 = vst [vmem:[#allocation2] sm:$0x1] %v8_v0 }
   0x3 LB: > { %s282_s15 = sadd.s32 4294967295, %s321_s14   ;;  %p286_p0 = scmp.ge.s32.totalorder %s321_s14, 1  ;;  %s321_s14 = sphi %s349_s14, %s15_s14  }
   0x4   : > { %p139_p1 = scmp.lt.s32.totalorder %s321_s14, 3 }
   0x6   : > { %p140_p2 = pnand %p286_p0, %p139_p1 }
   0x7   : > { %p161_p3 = scmp.lt.s32.totalorder (!%p140_p2), %s282_s15, 1  ;;  %v323_v1 = vmov (!%p140_p2), 0.0   ;;  %vm324_vm0 = vmmov (!%p140_p2), 0   ;;  %v325_v3 = vmov (!%p140_p2), 0   ;;  %v170_v5 = vld [vmem:[%s370_s1] sm:$0x1] (!%p140_p2)  ;;  %v179_v6 = vlaneseq (!%p140_p2) }
   0x8   : > { %143 = sbr.rel (%p140_p2) target bundleno = 237 (0xed), region = 32  ;;  %296 = vmatprep.subr.bf16.mxu0 (!%p140_p2), %v323_v1  ;;  %298 = vmatprep.mubr.msk.bf16.mxu0 (!%p140_p2), %vm324_vm0, %v323_v1  ;;  %vm189_vm1 = vcmask (!%p140_p2), 130048   ;;  %vm233_vm2 = vcmask (!%p140_p2), 122880  }
   0x9   : > { %v173_v2 = vld [vmem:[#allocation2] sm:$0x1] (!%p140_p2)  ;;  %313 = vset.pattern.permute.xlu0 (!%p140_p2), %v325_v3  ;;  %v180_v7 = vshrl.u32 (!%p140_p2), %v179_v6, 7 }
   0xa   : > { %176 = vperm.xlu0 (!%p140_p2), %313, %v173_v2  }
   0xb   : > { %v181_v8 = vsub.s32 (!%p140_p2), 0, %v180_v7 }
   0xf   : > { %s374_s15 = smov (!%p161_p3, %s282_s15), 1 }
  0x10   : > { %s293_s2 = sshll.u32 %s374_s15, 3  ;;  %s168_s23 = scalar_lea.vmem %s372_s3, %s374_s15 }
  0x11   : > { %s165_s18 = scalar_lea.vmem %s369_s0, %s293_s2 }
  0x12   : > { %v314_v4 = vld [vmem:[%s165_s18] sm:$0xff]  }
  0x13   : > { %297 = vmatpush3.bf16.msra.mxu0 %v314_v4 }
  0x16   : > { %299 = vmatmul.mubr.msk.bf16.vlgmr.msra.gmra.mrb[0].mxu0 %vm189_vm1, %v170_v5 }
  0x89   : > { %v177_v9 = vpop.permute.xlu0 %176 }
  0x8a   : > { %v182_v10 = vrot.slane %v177_v9, %v181_v8 }
  0xe9   : > { %v227_v11 = vpop.f32.mrb[0].mxu0 }
  0xea   : > { %v228_v12 = vadd.f32 %v227_v11, %v182_v10  ;;  %v300_v13 = vpop.f32.mrb[1].mxu0 }
  0xeb   : > { %v230_v14 = vpop.f32.mrb[2].mxu0 }
  0xec   : > { %234 = vst.msk [vmem:[%s168_s23] sm:$0x1] %vm233_vm2, %v228_v12  ;;  %v301_v15 = vpop.f32.mrb[3].mxu0 }
  0xed PF: > { %s15_s14 = sadd.s32 1, %s321_s14  }
  0xee   : > { %p12_p4 = scmp.ge.s32.totalorder %s15_s14, 4  }
  0xf0   :  { %14 = sbr.rel (!%p12_p4) target bundleno = 3 (0x3), region = 62 }

// kernel: multiscale_forward.8
= control target key start
LH: loop header
LB: loop body
LE: loop exit
PB: predicated region body
PF: predicated region fallthrough
CT: control target
= control target key end

     0   :  { %s519_s12 = smov 0   ;;  %s552_s0 = inlined_call_operand.vmem [shape: bf16[2,64,20], index: 0, kind: input, shape index: {}]   ;;  %s553_s1 = inlined_call_operand.vmem [shape: bf16[2,16,64], index: 1, kind: input, shape index: {}]   ;;  %s554_s2 = inlined_call_operand.vmem [shape: f32[16,1], index: 2, kind: input, shape index: {}]   ;;  %s555_s3 = inlined_call_operand.vmem [shape: bf16[2,16,16], index: 3, kind: output, shape index: {}]  }
   0x1 LB: > { %s406_s13 = sadd.s32 4294967295, %s493_s12   ;;  %p410_p0 = scmp.ge.s32.totalorder %s493_s12, 1  ;;  %s493_s12 = sphi %s519_s12, %s13_s12  }
   0x2   : > { %p137_p1 = scmp.lt.s32.totalorder %s493_s12, 3 }
   0x4   : > { %p138_p2 = pnand %p410_p0, %p137_p1 }
   0x5   : > { %p161_p3 = scmp.lt.s32.totalorder (!%p138_p2), %s406_s13, 1  ;;  %v495_v0 = vmov (!%p138_p2), 0.0   ;;  %vm496_vm0 = vmmov (!%p138_p2), 0   ;;  %s497_s18 = smov (!%p138_p2), 124   ;;  %v498_v5 = vmov (!%p138_p2), 0   ;;  %v320_v6 = vld [vmem:[%s554_s2] sm:$0xff] (!%p138_p2) }
   0x6   : > { %141 = sbr.rel (%p138_p2) target bundleno = 371 (0x173), region = 32  ;;  %455 = vmatprep.subr.bf16.mxu1 (!%p138_p2), %v495_v0  ;;  %443 = vmatprep.subr.bf16.mxu0 (!%p138_p2), %v495_v0  ;;  %v321_v7 = vld [vmem:[%s554_s2 + $0x8] sm:$0xff] (!%p138_p2)  ;;  %v485_v8 = vld [vmem:[%s553_s1] sm:$0xff] (!%p138_p2)   ;;  %vm222_vm1 = vcmask (!%p138_p2), 523264   ;;  %vm348_vm3 = vcmask (!%p138_p2), 125952  }
   0x7   : > { %463 = vmatprep.mubr.msk.bf16.mxu1 (!%p138_p2), %vm496_vm0, %v495_v0  ;;  %451 = vmatprep.mubr.msk.bf16.mxu0 (!%p138_p2), %vm496_vm0, %v495_v0  ;;  %v486_v13 = vld [vmem:[%s553_s1 + $0x8] sm:$0xff] (!%p138_p2)  }
   0x8   : > { %479 = vset.pattern.permute.xlu0 (!%p138_p2), %v498_v5  ;;  %480 = vset.pattern.permute.xlu1 (!%p138_p2), %v498_v5 }
   0xd   : > { %s557_s13 = smov (!%p161_p3, %s406_s13), 1 }
   0xe   : > { %s429_s14 = sshll.u32 %s557_s13, 5  ;;  %s430_s27 = sshll.u32 %s557_s13, 3 }
   0xf   : > { %s165_s17 = scalar_lea.vmem %s552_s0, %s429_s14  ;;  %s170_s30 = scalar_lea.vmem %s555_s3, %s430_s27 }
  0x10   : > { %v481_v1 = vld [vmem:[%s165_s17] sm:$0xff]   ;;  %v482_v2 = vld [vmem:[%s165_s17 + $0x8] sm:$0xff]   ;;  %v483_v3 = vld [vmem:[%s165_s17 + $0x10] sm:$0xff]  }
  0x11   : > { %210 = vrot.lane.b32.xlu0 %v481_v1, %s497_s18  ;;  %456 = vmatpush3.bf16.msra.mxu1 %v481_v1  ;;  %v484_v4 = vld [vmem:[%s165_s17 + $0x18] sm:$0xff]  }
  0x12   : > { %457 = vmatprep.subr.bf16.mxu1 %v495_v0  ;;  %214 = vrot.lane.b32.xlu1 %v483_v3, %s497_s18 }
  0x15   : > { %212 = vrot.lane.b32.xlu0 %v482_v2, %s497_s18  ;;  %458 = vmatpush3.bf16.msra.mxu1 %v482_v2 }
  0x16   : > { %459 = vmatprep.subr.bf16.mxu1 %v495_v0  ;;  %216 = vrot.lane.b32.xlu1 %v484_v4, %s497_s18 }
  0x19   : > { %460 = vmatpush3.bf16.msra.mxu1 %v483_v3  ;;  %324 = vperm.xlu0 %479, %v320_v6  }
  0x1a   : > { %461 = vmatprep.subr.bf16.mxu1 %v495_v0  ;;  %329 = vperm.xlu1 %480, %v321_v7  }
  0x1d   : > { %462 = vmatpush3.bf16.msra.mxu1 %v484_v4 }
  0x20   : > { %464 = vmatmul.mubr.msk.bf16.vlgmr.msra.gmra.mrb[0].mxu1 %vm222_vm1, %v485_v8 }
  0x83   : > { %v211_v9 = vpop.permute.xlu0 %210 }
  0x84   : > { %444 = vmatpush3.bf16.msra.mxu0 %v211_v9  ;;  %v215_v11 = vpop.permute.xlu1 %214 }
  0x85   : > { %445 = vmatprep.subr.bf16.mxu0 %v495_v0 }
  0x87   : > { %v213_v10 = vpop.permute.xlu0 %212 }
  0x88   : > { %446 = vmatpush3.bf16.msra.mxu0 %v213_v10  ;;  %v217_v12 = vpop.permute.xlu1 %216 }
  0x89   : > { %447 = vmatprep.subr.bf16.mxu0 %v495_v0 }
  0x8c   : > { %448 = vmatpush3.bf16.msra.mxu0 %v215_v11 }
  0x8d   : > { %449 = vmatprep.subr.bf16.mxu0 %v495_v0 }
  0x90   : > { %450 = vmatpush3.bf16.msra.mxu0 %v217_v12 }
  0x93   : > { %452 = vmatmul.mubr.msk.bf16.vlgmr.msra.gmra.mrb[0].mxu0 %vm222_vm1, %v486_v13 }
  0x98   : > { %v325_v19 = vpop.permute.xlu0 %324 }
  0x99   : > { %v330_v23 = vpop.permute.xlu1 %329 }
  0xf3   : > { %v313_v14 = vpop.f32.mrb[0].mxu1 }
  0xf4   : > { %v465_v15 = vpop.f32.mrb[1].mxu1 }
  0xf5   : > { %v316_v16 = vpop.f32.mrb[2].mxu1 }
  0xf6   : > { %v466_v17 = vpop.f32.mrb[3].mxu1 }
 0x166   : > { %v260_v18 = vpop.f32.mrb[0].mxu0 }
 0x167   : > { %v314_v20 = vadd.f32 %v313_v14, %v260_v18  ;;  %v453_v21 = vpop.f32.mrb[1].mxu0 }
 0x168   : > { %v263_v22 = vpop.f32.mrb[2].mxu0 }
 0x169   : > { %v317_v24 = vadd.f32 %v316_v16, %v263_v22  ;;  %v332_v25 = vadd.f32 %v325_v19, %v314_v20  ;;  %v454_v26 = vpop.f32.mrb[3].mxu0 }
 0x16b   : > { %vm334_vm2 = vcmp.ge.f32.partialorder %v332_v25, 0.0  ;;  %v336_v27 = vmul.f32 0.2, %v332_v25  ;;  %v333_v28 = vadd.f32 %v330_v23, %v317_v24 }
 0x16d   : > { %v338_v29 = vsel %vm334_vm2, %v332_v25, %v336_v27  ;;  %vm335_vm4 = vcmp.ge.f32.partialorder %v333_v28, 0.0  ;;  %v337_v30 = vmul.f32 0.2, %v333_v28 }
 0x16e   : > { %v431_v31 = vpack.c.bf16 %v338_v29, %v338_v29 }
 0x16f   : > { %v339_v32 = vsel %vm335_vm4, %v333_v28, %v337_v30 }
 0x170   : > { %349 = vst.msk [vmem:[%s170_s30] sm:$0xf] %vm348_vm3, %v431_v31  ;;  %v432_v33 = vpack.c.bf16 %v339_v32, %v339_v32 }
 0x172   : > { %350 = vst.msk [vmem:[%s170_s30 + $0x4] sm:$0xf] %vm348_vm3, %v432_v33 }
 0x173 PF: > { %s13_s12 = sadd.s32 1, %s493_s12  }
 0x174   : > { %p10_p4 = scmp.ge.s32.totalorder %s13_s12, 4  }
 0x176   :  { %12 = sbr.rel (!%p10_p4) target bundleno = 1 (0x1), region = 63 }

// kernel: multiscale_forward.10
= control target key start
LH: loop header
LB: loop body
LE: loop exit
PB: predicated region body
PF: predicated region fallthrough
CT: control target
= control target key end

     0   :  { %s282_s9 = smov 0   ;;  %s306_s0 = inlined_call_operand.vmem [shape: bf16[2,6,4,72], index: 0, kind: input, shape index: {}]   ;;  %s307_s1 = inlined_call_operand.vmem [shape: f32[1,64], index: 1, kind: input, shape index: {}]   ;;  %s308_s2 = inlined_call_operand.vmem [shape: bf16[2,4,64], index: 2, kind: output, shape index: {}]  }
   0x1 LB: > { %s238_s10 = sadd.s32 4294967295, %s264_s9   ;;  %p242_p0 = scmp.ge.s32.totalorder %s264_s9, 1  ;;  %s264_s9 = sphi %s282_s9, %s12_s9  }
   0x2   : > { %p112_p1 = scmp.lt.s32.totalorder %s264_s9, 3 }
   0x4   : > { %p113_p2 = pnand %p242_p0, %p112_p1 }
   0x5   : > { %p133_p3 = scmp.lt.s32.totalorder (!%p113_p2), %s238_s10, 1  ;;  %s266_s15 = smov (!%p113_p2), 120   ;;  %v245_v22 = vld [vmem:[%s307_s1] ss:$0 sm:$0xff] (!%p113_p2)  ;;  %vm183_vm0 = vcmask (!%p113_p2), 517120  }
   0x6   : > { %116 = sbr.rel (%p113_p2) target bundleno = 148 (0x94), region = 28 }
   0xd   : > { %s310_s10 = smov (!%p133_p3, %s238_s10), 1 }
   0xe   : > { %s248_s11 = smul.u32 12, %s310_s10  ;;  %s244_s18 = sshll.u32 %s310_s10, 1 }
   0xf   : > { %s141_s21 = scalar_lea.vmem %s308_s2, %s244_s18 }
  0x10   : > { %s137_s14 = scalar_lea.vmem %s306_s0, %s248_s11 }
  0x11   : > { %v142_v0 = vld [vmem:[%s137_s14] sm:$0x3]  ;;  %v143_v1 = vld [vmem:[%s137_s14 + $0x2] sm:$0x3]  ;;  %v144_v2 = vld [vmem:[%s137_s14 + $0x4] sm:$0x3] }
  0x12   : > { %v148_v3 = vunpack.c.l.bf16 %v142_v0  ;;  %v149_v4 = vunpack.c.l.bf16 %v143_v1  ;;  %v145_v5 = vld [vmem:[%s137_s14 + $0x6] sm:$0x3]  ;;  %v151_v6 = vunpack.c.l.bf16 %v144_v2  ;;  %v146_v7 = vld [vmem:[%s137_s14 + $0x8] sm:$0x3]  ;;  %v147_v10 = vld [vmem:[%s137_s14 + $0xa] sm:$0x3] }
  0x13   : > { %v153_v9 = vunpack.c.l.bf16 %v145_v5  ;;  %v155_v12 = vunpack.c.l.bf16 %v146_v7  ;;  %v157_v14 = vunpack.c.l.bf16 %v147_v10 }
  0x14   : > { %160 = vrot.lane.b32.xlu0 %v148_v3, %s266_s15  ;;  %v150_v8 = vadd.f32 %v149_v4, %v148_v3  ;;  %170 = vrot.lane.b32.xlu1 %v151_v6, %s266_s15 }
  0x16   : > { %v152_v11 = vadd.f32 %v151_v6, %v150_v8 }
  0x18   : > { %165 = vrot.lane.b32.xlu0 %v149_v4, %s266_s15  ;;  %v154_v13 = vadd.f32 %v153_v9, %v152_v11 }
  0x1a   : > { %v156_v15 = vadd.f32 %v155_v12, %v154_v13 }
  0x1c   : > { %v158_v16 = vadd.f32 %v157_v14, %v156_v15 }
  0x86   : > { %v161_v17 = vpop.permute.xlu0 %160  ;;  %v171_v20 = vpop.permute.xlu1 %170 }
  0x87   : > { %v163_v18 = vadd.f32 %v161_v17, %v158_v16 }
  0x8a   : > { %v166_v19 = vpop.permute.xlu0 %165 }
  0x8b   : > { %v168_v21 = vadd.f32 %v166_v19, %v163_v18 }
  0x8d   : > { %v173_v23 = vadd.f32 %v171_v20, %v168_v21 }
  0x8f   : > { %v181_v24 = vmul.f32 %v245_v22, %v173_v23 }
  0x91   : > { %v182_v25 = vpack.c.bf16 %v181_v24, %v181_v24 }
  0x93   : > { %184 = vst.msk [vmem:[%s141_s21] sm:$0x3] %vm183_vm0, %v182_v25 }
  0x94 PF: > { %s12_s9 = sadd.s32 1, %s264_s9  }
  0x95   : > { %p9_p4 = scmp.ge.s32.totalorder %s12_s9, 4  }
  0x97   :  { %11 = sbr.rel (!%p9_p4) target bundleno = 1 (0x1), region = 58 }

// kernel: multiscale_forward.11
= control target key start
LH: loop header
LB: loop body
LE: loop exit
PB: predicated region body
PF: predicated region fallthrough
CT: control target
= control target key end

     0   :  { %s434_s12 = smov 0   ;;  %s464_s0 = inlined_call_operand.vmem [shape: bf16[2,32,20], index: 0, kind: input, shape index: {}]   ;;  %s465_s1 = inlined_call_operand.vmem [shape: bf16[2,8,32], index: 1, kind: input, shape index: {}]   ;;  %s466_s2 = inlined_call_operand.vmem [shape: f32[8,1], index: 2, kind: input, shape index: {}]   ;;  %s467_s3 = inlined_call_operand.vmem [shape: bf16[2,8,16], index: 3, kind: output, shape index: {}]  }
   0x1 LB: > { %s348_s13 = sadd.s32 4294967295, %s408_s12   ;;  %p352_p0 = scmp.ge.s32.totalorder %s408_s12, 1  ;;  %s408_s12 = sphi %s434_s12, %s13_s12  }
   0x2   : > { %p137_p1 = scmp.lt.s32.totalorder %s408_s12, 3 }
   0x4   : > { %p138_p2 = pnand %p352_p0, %p137_p1 }
   0x5   : > { %p160_p3 = scmp.lt.s32.totalorder (!%p138_p2), %s348_s13, 1  ;;  %v410_v0 = vmov (!%p138_p2), 0.0   ;;  %vm411_vm0 = vmmov (!%p138_p2), 0   ;;  %v282_v1 = vld [vmem:[%s466_s2] sm:$0xff] (!%p138_p2)  ;;  %v412_v2 = vmov (!%p138_p2), 0   ;;  %s413_s20 = smov (!%p138_p2), 124  }
   0x6   : > { %141 = sbr.rel (%p138_p2) target bundleno = 361 (0x169), region = 32  ;;  %378 = vmatprep.subr.bf16.mxu1 (!%p138_p2), %v410_v0  ;;  %370 = vmatprep.subr.bf16.mxu0 (!%p138_p2), %v410_v0  ;;  %v174_v5 = vld [vmem:[%s465_s1] sm:$0xf] (!%p138_p2)  ;;  %vm193_vm1 = vcmask (!%p138_p2), 261120   ;;  %v356_v8 = vld [vmem:[%s465_s1 + $0x4] sm:$0xf] (!%p138_p2) }
   0x7   : > { %382 = vmatprep.mubr.msk.bf16.mxu1 (!%p138_p2), %vm411_vm0, %v410_v0  ;;  %374 = vmatprep.mubr.msk.bf16.mxu0 (!%p138_p2), %vm411_vm0, %v410_v0  ;;  %vm293_vm3 = vcmask (!%p138_p2), 125952  }
   0x8   : > { %398 = vset.pattern.permute.xlu1 (!%p138_p2), %v412_v2  ;;  %399 = vset.pattern.permute.xlu0 (!%p138_p2), %v412_v2 }
   0x9   : > { %285 = vperm.xlu1 (!%p138_p2), %398, %v282_v1  }
   0xd   : > { %s469_s13 = smov (!%p160_p3, %s348_s13), 1 }
   0xe   : > { %s363_s16 = sshll.u32 %s469_s13, 4  ;;  %s355_s25 = sshll.u32 %s469_s13, 2 }
   0xf   : > { %s164_s19 = scalar_lea.vmem %s464_s0, %s363_s16  ;;  %s168_s28 = scalar_lea.vmem %s467_s3, %s355_s25 }
  0x10   : > { %v400_v3 = vld [vmem:[%s164_s19] sm:$0xff]   ;;  %v401_v4 = vld [vmem:[%s164_s19 + $0x8] sm:$0xff]  }
  0x11   : > { %187 = vrot.lane.b32.xlu0 %v400_v3, %s413_s20  ;;  %379 = vmatpush3.bf16.msra.mxu1 %v400_v3 }
  0x12   : > { %380 = vmatprep.subr.bf16.mxu1 %v410_v0 }
  0x15   : > { %189 = vrot.lane.b32.xlu0 %v401_v4, %s413_s20  ;;  %381 = vmatpush3.bf16.msra.mxu1 %v401_v4 }
  0x18   : > { %383 = vmatmul.mubr.msk.bf16.vlgmr.msra.gmra.mrb[0].mxu1 %vm193_vm1, %v174_v5 }
  0x83   : > { %v188_v6 = vpop.permute.xlu0 %187 }
  0x84   : > { %371 = vmatpush3.bf16.msra.mxu0 %v188_v6 }
  0x85   : > { %372 = vmatprep.subr.bf16.mxu0 %v410_v0 }
  0x87   : > { %v190_v7 = vpop.permute.xlu0 %189 }
  0x88   : > { %373 = vmatpush3.bf16.msra.mxu0 %v190_v7  ;;  %v286_v14 = vpop.permute.xlu1 %285 }
  0x8b   : > { %375 = vmatmul.mubr.msk.bf16.vlgmr.msra.gmra.mrb[0].mxu0 %vm193_vm1, %v356_v8 }
  0xeb   : > { %v276_v9 = vpop.f32.mrb[0].mxu1 }
  0xec   : > { %v384_v10 = vpop.f32.mrb[1].mxu1 }
  0xed   : > { %v279_v11 = vpop.f32.mrb[2].mxu1 }
  0xee   : > { %v385_v12 = vpop.f32.mrb[3].mxu1 }
 0x15e   : > { %v231_v13 = vpop.f32.mrb[0].mxu0 }
 0x15f   : > { %v277_v15 = vadd.f32 %v276_v9, %v231_v13  ;;  %v376_v16 = vpop.f32.mrb[1].mxu0 }
 0x160   : > { %v234_v17 = vpop.f32.mrb[2].mxu0 }
 0x161   : > { %v288_v18 = vadd.f32 %v286_v14, %v277_v15  ;;  %v377_v19 = vpop.f32.mrb[3].mxu0 }
 0x163   : > { %vm289_vm2 = vcmp.ge.f32.partialorder %v288_v18, 0.0  ;;  %v290_v20 = vmul.f32 0.2, %v288_v18 }
 0x165   : > { %v291_v21 = vsel %vm289_vm2, %v288_v18, %v290_v20 }
 0x166   : > { %v292_v22 = vpack.c.bf16 %v291_v21, %v291_v21 }
 0x168   : > { %294 = vst.msk [vmem:[%s168_s28] sm:$0xf] %vm293_vm3, %v292_v22 }
 0x169 PF: > { %s13_s12 = sadd.s32 1, %s408_s12  }
 0x16a   : > { %p10_p4 = scmp.ge.s32.totalorder %s13_s12, 4  }
 0x16c   :  { %12 = sbr.rel (!%p10_p4) target bundleno = 1 (0x1), region = 63 }

// kernel: multiscale_forward.12
= control target key start
LH: loop header
LB: loop body
LE: loop exit
PB: predicated region body
PF: predicated region fallthrough
CT: control target
= control target key end

     0   :  { %s519_s12 = smov 0   ;;  %s552_s0 = inlined_call_operand.vmem [shape: bf16[2,64,6], index: 0, kind: input, shape index: {}]   ;;  %s553_s1 = inlined_call_operand.vmem [shape: bf16[2,16,64], index: 1, kind: input, shape index: {}]   ;;  %s554_s2 = inlined_call_operand.vmem [shape: f32[16,1], index: 2, kind: input, shape index: {}]   ;;  %s555_s3 = inlined_call_operand.vmem [shape: bf16[2,16,4], index: 3, kind: output, shape index: {}]  }
   0x1 LB: > { %s406_s13 = sadd.s32 4294967295, %s493_s12   ;;  %p410_p0 = scmp.ge.s32.totalorder %s493_s12, 1  ;;  %s493_s12 = sphi %s519_s12, %s13_s12  }
   0x2   : > { %p137_p1 = scmp.lt.s32.totalorder %s493_s12, 3 }
   0x4   : > { %p138_p2 = pnand %p410_p0, %p137_p1 }
   0x5   : > { %p161_p3 = scmp.lt.s32.totalorder (!%p138_p2), %s406_s13, 1  ;;  %v495_v0 = vmov (!%p138_p2), 0.0   ;;  %vm496_vm0 = vmmov (!%p138_p2), 0   ;;  %s497_s18 = smov (!%p138_p2), 126   ;;  %v498_v5 = vmov (!%p138_p2), 0   ;;  %v320_v6 = vld [vmem:[%s554_s2] sm:$0xff] (!%p138_p2) }
   0x6   : > { %141 = sbr.rel (%p138_p2) target bundleno = 371 (0x173), region = 32  ;;  %455 = vmatprep.subr.bf16.mxu1 (!%p138_p2), %v495_v0  ;;  %443 = vmatprep.subr.bf16.mxu0 (!%p138_p2), %v495_v0  ;;  %v321_v7 = vld [vmem:[%s554_s2 + $0x8] sm:$0xff] (!%p138_p2)  ;;  %v485_v8 = vld [vmem:[%s553_s1] sm:$0xff] (!%p138_p2)   ;;  %vm222_vm1 = vcmask (!%p138_p2), 523264   ;;  %vm348_vm3 = vcmask (!%p138_p2), 27648  }
   0x7   : > { %463 = vmatprep.mubr.msk.bf16.mxu1 (!%p138_p2), %vm496_vm0, %v495_v0  ;;  %451 = vmatprep.mubr.msk.bf16.mxu0 (!%p138_p2), %vm496_vm0, %v495_v0  ;;  %v486_v13 = vld [vmem:[%s553_s1 + $0x8] sm:$0xff] (!%p138_p2)  }
   0x8   : > { %479 = vset.pattern.permute.xlu0 (!%p138_p2), %v498_v5  ;;  %480 = vset.pattern.permute.xlu1 (!%p138_p2), %v498_v5 }
   0xd   : > { %s557_s13 = smov (!%p161_p3, %s406_s13), 1 }
   0xe   : > { %s429_s14 = sshll.u32 %s557_s13, 5  ;;  %s430_s27 = sshll.u32 %s557_s13, 3 }
   0xf   : > { %s165_s17 = scalar_lea.vmem %s552_s0, %s429_s14  ;;  %s170_s30 = scalar_lea.vmem %s555_s3, %s430_s27 }
  0x10   : > { %v481_v1 = vld [vmem:[%s165_s17] sm:$0xff]   ;;  %v482_v2 = vld [vmem:[%s165_s17 + $0x8] sm:$0xff]   ;;  %v483_v3 = vld [vmem:[%s165_s17 + $0x10] sm:$0xff]  }
  0x11   : > { %210 = vrot.lane.b32.xlu0 %v481_v1, %s497_s18  ;;  %456 = vmatpush3.bf16.msra.mxu1 %v481_v1  ;;  %v484_v4 = vld [vmem:[%s165_s17 + $0x18] sm:$0xff]  }
  0x12   : > { %457 = vmatprep.subr.bf16.mxu1 %v495_v0  ;;  %214 = vrot.lane.b32.xlu1 %v483_v3, %s497_s18 }
  0x15   : > { %212 = vrot.lane.b32.xlu0 %v482_v2, %s497_s18  ;;  %458 = vmatpush3.bf16.msra.mxu1 %v482_v2 }
  0x16   : > { %459 = vmatprep.subr.bf16.mxu1 %v495_v0  ;;  %216 = vrot.lane.b32.xlu1 %v484_v4, %s497_s18 }
  0x19   : > { %460 = vmatpush3.bf16.msra.mxu1 %v483_v3  ;;  %324 = vperm.xlu0 %479, %v320_v6  }
  0x1a   : > { %461 = vmatprep.subr.bf16.mxu1 %v495_v0  ;;  %329 = vperm.xlu1 %480, %v321_v7  }
  0x1d   : > { %462 = vmatpush3.bf16.msra.mxu1 %v484_v4 }
  0x20   : > { %464 = vmatmul.mubr.msk.bf16.vlgmr.msra.gmra.mrb[0].mxu1 %vm222_vm1, %v485_v8 }
  0x83   : > { %v211_v9 = vpop.permute.xlu0 %210 }
  0x84   : > { %444 = vmatpush3.bf16.msra.mxu0 %v211_v9  ;;  %v215_v11 = vpop.permute.xlu1 %214 }
  0x85   : > { %445 = vmatprep.subr.bf16.mxu0 %v495_v0 }
  0x87   : > { %v213_v10 = vpop.permute.xlu0 %212 }
  0x88   : > { %446 = vmatpush3.bf16.msra.mxu0 %v213_v10  ;;  %v217_v12 = vpop.permute.xlu1 %216 }
  0x89   : > { %447 = vmatprep.subr.bf16.mxu0 %v495_v0 }
  0x8c   : > { %448 = vmatpush3.bf16.msra.mxu0 %v215_v11 }
  0x8d   : > { %449 = vmatprep.subr.bf16.mxu0 %v495_v0 }
  0x90   : > { %450 = vmatpush3.bf16.msra.mxu0 %v217_v12 }
  0x93   : > { %452 = vmatmul.mubr.msk.bf16.vlgmr.msra.gmra.mrb[0].mxu0 %vm222_vm1, %v486_v13 }
  0x98   : > { %v325_v19 = vpop.permute.xlu0 %324 }
  0x99   : > { %v330_v23 = vpop.permute.xlu1 %329 }
  0xf3   : > { %v313_v14 = vpop.f32.mrb[0].mxu1 }
  0xf4   : > { %v465_v15 = vpop.f32.mrb[1].mxu1 }
  0xf5   : > { %v316_v16 = vpop.f32.mrb[2].mxu1 }
  0xf6   : > { %v466_v17 = vpop.f32.mrb[3].mxu1 }
 0x166   : > { %v260_v18 = vpop.f32.mrb[0].mxu0 }
 0x167   : > { %v314_v20 = vadd.f32 %v313_v14, %v260_v18  ;;  %v453_v21 = vpop.f32.mrb[1].mxu0 }
 0x168   : > { %v263_v22 = vpop.f32.mrb[2].mxu0 }
 0x169   : > { %v317_v24 = vadd.f32 %v316_v16, %v263_v22  ;;  %v332_v25 = vadd.f32 %v325_v19, %v314_v20  ;;  %v454_v26 = vpop.f32.mrb[3].mxu0 }
 0x16b   : > { %vm334_vm2 = vcmp.ge.f32.partialorder %v332_v25, 0.0  ;;  %v336_v27 = vmul.f32 0.2, %v332_v25  ;;  %v333_v28 = vadd.f32 %v330_v23, %v317_v24 }
 0x16d   : > { %v338_v29 = vsel %vm334_vm2, %v332_v25, %v336_v27  ;;  %vm335_vm4 = vcmp.ge.f32.partialorder %v333_v28, 0.0  ;;  %v337_v30 = vmul.f32 0.2, %v333_v28 }
 0x16e   : > { %v431_v31 = vpack.c.bf16 %v338_v29, %v338_v29 }
 0x16f   : > { %v339_v32 = vsel %vm335_vm4, %v333_v28, %v337_v30 }
 0x170   : > { %349 = vst.msk [vmem:[%s170_s30] sm:$0xf] %vm348_vm3, %v431_v31  ;;  %v432_v33 = vpack.c.bf16 %v339_v32, %v339_v32 }
 0x172   : > { %350 = vst.msk [vmem:[%s170_s30 + $0x4] sm:$0xf] %vm348_vm3, %v432_v33 }
 0x173 PF: > { %s13_s12 = sadd.s32 1, %s493_s12  }
 0x174   : > { %p10_p4 = scmp.ge.s32.totalorder %s13_s12, 4  }
 0x176   :  { %12 = sbr.rel (!%p10_p4) target bundleno = 1 (0x1), region = 63 }

// kernel: multiscale_forward.13
= control target key start
LH: loop header
LB: loop body
LE: loop exit
PB: predicated region body
PF: predicated region fallthrough
CT: control target
= control target key end

     0   :  { %s349_s14 = smov 0   ;;  %s369_s0 = inlined_call_operand.vmem [shape: bf16[2,16,4], index: 0, kind: input, shape index: {}]   ;;  %s370_s1 = inlined_call_operand.vmem [shape: bf16[1,16], index: 1, kind: input, shape index: {}]   ;;  %s371_s2 = inlined_call_operand.<no memory space> [shape: f32[1,1], index: 2, kind: input, shape index: {}]   ;;  %s372_s3 = inlined_call_operand.vmem [shape: f32[2,1,4], index: 3, kind: output, shape index: {}]  }
   0x1   :  { %v8_v0 = vstv %s371_s2 }
   0x2   :  { %9 = vst [vmem:[#allocation2] sm:$0x1] %v8_v0 }
   0x3 LB: > { %s282_s15 = sadd.s32 4294967295, %s321_s14   ;;  %p286_p0 = scmp.ge.s32.totalorder %s321_s14, 1  ;;  %s321_s14 = sphi %s349_s14, %s15_s14  }
   0x4   : > { %p139_p1 = scmp.lt.s32.totalorder %s321_s14, 3 }
   0x6   : > { %p140_p2 = pnand %p286_p0, %p139_p1 }
   0x7   : > { %p161_p3 = scmp.lt.s32.totalorder (!%p140_p2), %s282_s15, 1  ;;  %v323_v1 = vmov (!%p140_p2), 0.0   ;;  %vm324_vm0 = vmmov (!%p140_p2), 0   ;;  %v325_v3 = vmov (!%p140_p2), 0   ;;  %v170_v5 = vld [vmem:[%s370_s1] sm:$0x1] (!%p140_p2)  ;;  %v179_v6 = vlaneseq (!%p140_p2) }
   0x8   : > { %143 = sbr.rel (%p140_p2) target bundleno = 237 (0xed), region = 32  ;;  %296 = vmatprep.subr.bf16.mxu0 (!%p140_p2), %v323_v1  ;;  %298 = vmatprep.mubr.msk.bf16.mxu0 (!%p140_p2), %vm324_vm0, %v323_v1  ;;  %vm189_vm1 = vcmask (!%p140_p2), 130048   ;;  %vm233_vm2 = vcmask (!%p140_p2), 24576  }
   0x9   : > { %v173_v2 = vld [vmem:[#allocation2] sm:$0x1] (!%p140_p2)  ;;  %313 = vset.pattern.permute.xlu0 (!%p140_p2), %v325_v3  ;;  %v180_v7 = vshrl.u32 (!%p140_p2), %v179_v6, 7 }
   0xa   : > { %176 = vperm.xlu0 (!%p140_p2), %313, %v173_v2  }
   0xb   : > { %v181_v8 = vsub.s32 (!%p140_p2), 0, %v180_v7 }
   0xf   : > { %s374_s15 = smov (!%p161_p3, %s282_s15), 1 }
  0x10   : > { %s293_s2 = sshll.u32 %s374_s15, 3  ;;  %s168_s23 = scalar_lea.vmem %s372_s3, %s374_s15 }
  0x11   : > { %s165_s18 = scalar_lea.vmem %s369_s0, %s293_s2 }
  0x12   : > { %v314_v4 = vld [vmem:[%s165_s18] sm:$0xff]  }
  0x13   : > { %297 = vmatpush3.bf16.msra.mxu0 %v314_v4 }
  0x16   : > { %299 = vmatmul.mubr.msk.bf16.vlgmr.msra.gmra.mrb[0].mxu0 %vm189_vm1, %v170_v5 }
  0x89   : > { %v177_v9 = vpop.permute.xlu0 %176 }
  0x8a   : > { %v182_v10 = vrot.slane %v177_v9, %v181_v8 }
  0xe9   : > { %v227_v11 = vpop.f32.mrb[0].mxu0 }
  0xea   : > { %v228_v12 = vadd.f32 %v227_v11, %v182_v10  ;;  %v300_v13 = vpop.f32.mrb[1].mxu0 }
  0xeb   : > { %v230_v14 = vpop.f32.mrb[2].mxu0 }
  0xec   : > { %234 = vst.msk [vmem:[%s168_s23] sm:$0x1] %vm233_vm2, %v228_v12  ;;  %v301_v15 = vpop.f32.mrb[3].mxu0 }
  0xed PF: > { %s15_s14 = sadd.s32 1, %s321_s14  }
  0xee   : > { %p12_p4 = scmp.ge.s32.totalorder %s15_s14, 4  }
  0xf0   :  { %14 = sbr.rel (!%p12_p4) target bundleno = 3 (0x3), region = 62 }

</bundles_post_ra>
